<compile_context>
chip_gen: v5e
topology: v5e:2x2
jax: 0.10.0
libtpu: 0.0.40
codegen_flags: <defaults>
</compile_context>

<pallas_src>
import numpy as np
import jax
import jax.numpy as jnp
from functools import partial
from jax import lax
from jax.experimental import pallas as pl
from jax.experimental.pallas import tpu as pltpu

# Module "args" (deterministic, in-script). temperature / base_temperature are
# defined in __init__ but never used in forward.
TEMPERATURE = 0.07        # args.Intersubsim_temp      (unused in forward)
BASE_TEMPERATURE = 0.07   # args.Intersubsim_base_temp (unused in forward)
DENS_TEMPERATURE = 0.7    # args.Intersubsim_dens_temp

_VMEM_LIMIT = 48 * 1024 * 1024   # explicit scoped-VMEM limit, safe on v5e/v6e/v7x


def _round_up(x, m):
    return ((x + m - 1) // m) * m


# ----------------------------------------------------------------------------
# Kernel 1: per-group centroids + raw density statistic, tiled over N with a
# two-phase grid (phase 0: centroid accumulation, phase 1: distances).
# ----------------------------------------------------------------------------
def _group_stats_kernel(gidc_ref, gidr_ref, f_ref, invc_ref,
                        cent_ref, sumroot_ref, *, k_pad):
    phase = pl.program_id(0)
    t = pl.program_id(1)
    t_last = pl.num_programs(1) - 1

    f = f_ref[...]                                   # [TILE_N, D] f32 (exact)
    tile_n = f.shape[0]

    @pl.when(jnp.logical_and(phase == 0, t == 0))
    def _init():
        cent_ref[...] = jnp.zeros_like(cent_ref)
        sumroot_ref[...] = jnp.zeros_like(sumroot_ref)

    @pl.when(phase == 0)
    def _accumulate_centroid():
        # transposed one-hot built in-kernel: gT[k, r] = (gid[r] == k), bf16 MXU operand
        gT = (lax.broadcasted_iota(jnp.int32, (k_pad, tile_n), 0)
              == gidr_ref[...]).astype(jnp.bfloat16)           # [K_pad, TILE_N]
        cent_ref[...] += lax.dot_general(
            gT, f.astype(jnp.bfloat16), (((1,), (0,)), ((), ())),
            preferred_element_type=jnp.float32)

    @pl.when(jnp.logical_and(phase == 0, t == t_last))
    def _normalize():
        cent_ref[...] *= invc_ref[...]               # [K_pad, 1] broadcast over lanes

    @pl.when(phase == 1)
    def _accumulate_density():
        g = (lax.broadcasted_iota(jnp.int32, (tile_n, k_pad), 1)
             == gidc_ref[...]).astype(jnp.bfloat16)             # [TILE_N, K_pad]
        cen_row = lax.dot_general(
            g, cent_ref[...].astype(jnp.bfloat16), (((1,), (0,)), ((), ())),
            preferred_element_type=jnp.float32)                 # [TILE_N, D]
        diff = f - cen_row                                       # exact f32 features
        d2 = jnp.sum(diff * diff, axis=1, keepdims=True)         # [TILE_N, 1]
        root = jnp.sqrt(jnp.sqrt(jnp.maximum(d2, 0.0)))          # dist ** 0.5
        # group-wise sum of roots on the MXU (ones-like one-hot matvec), not XLU
        gT = (lax.broadcasted_iota(jnp.int32, (k_pad, tile_n), 0)
              == gidr_ref[...]).astype(jnp.bfloat16)            # [K_pad, TILE_N]
        sumroot_ref[...] += lax.dot_general(
            gT, root.astype(jnp.bfloat16), (((1,), (0,)), ((), ())),
            preferred_element_type=jnp.float32)                 # [K_pad, 1]


# ----------------------------------------------------------------------------
# Kernel 2: sim = f @ (centroid/density).T, masked soft-target CE, row filtering
# and the final mean — tiled over N with scalar accumulators.
# ----------------------------------------------------------------------------
def _sim_ce_loss_kernel(f_ref, cent_ref, srow_ref, lrow_ref, sgrp_ref, lgrp_ref,
                        out_ref, tot_ref, cnt_ref, *, k, k_pad):
    t = pl.program_id(0)

    @pl.when(t == 0)
    def _init():
        tot_ref[...] = jnp.zeros_like(tot_ref)
        cnt_ref[...] = jnp.zeros_like(cnt_ref)

    fb = f_ref[...].astype(jnp.bfloat16)              # [TILE_N, D] bf16 MXU operand
    # centroid.T pre-scaled by 1/density (bf16) -> plain MXU matmul, no N x K divide
    sim = jnp.dot(fb, cent_ref[...], preferred_element_type=jnp.float32)  # [TILE_N, K_pad]

    srow = srow_ref[...]                              # [TILE_N, 1] raw subject per row
    lrow = lrow_ref[...]                              # [TILE_N, 1] raw label per row
    sgrp = sgrp_ref[...]                              # [1, K_pad] unique-subject index i
    lgrp = lgrp_ref[...]                              # [1, K_pad] per-subject label index j

    kvalid = lax.broadcasted_iota(jnp.int32, (1, k_pad), 1) < k          # [1, K_pad]
    subj_eq = srow == sgrp                                               # [TILE_N, K_pad]
    lab_eq = lrow == lgrp
    pos_f = jnp.logical_and(jnp.logical_and(jnp.logical_not(subj_eq), lab_eq),
                            kvalid).astype(jnp.float32)
    # logit mask forced to 0 on padded lanes -> their logits are exactly 0 and each
    # contributes exp(0)=1, removed arithmetically below (no N x K select needed).
    lmask_f = jnp.logical_and(jnp.logical_not(jnp.logical_and(subj_eq, lab_eq)),
                              kvalid).astype(jnp.float32)

    sim_max = jnp.max(jnp.where(kvalid, sim, jnp.float32(-1e30)),
                      axis=1, keepdims=True)
    s = (sim - sim_max) * lmask_f

    sum_exp = jnp.sum(jnp.exp(s), axis=1, keepdims=True) - jnp.float32(k_pad - k)
    lse = jnp.log(sum_exp)                                               # [TILE_N, 1]

    mask_sum = jnp.sum(pos_f, axis=1, keepdims=True)                     # [TILE_N, 1]
    ce = mask_sum * lse - jnp.sum(pos_f * s, axis=1, keepdims=True)      # soft-target CE
    keep = mask_sum > 0                                                  # index_select rows
    inv_ms = pl.reciprocal(jnp.maximum(mask_sum, 1.0), approx=True)      # EUP slot
    per_row = jnp.where(keep, ce * inv_ms, 0.0)

    tot_ref[...] += jnp.sum(per_row, axis=0, keepdims=True)              # [1, 1]
    cnt_ref[...] += jnp.sum(keep.astype(jnp.float32), axis=0, keepdims=True)

    @pl.when(t == pl.num_programs(0) - 1)
    def _finalize():
        out_ref[...] = tot_ref[...] * pl.reciprocal(cnt_ref[...], approx=True)


# ----------------------------------------------------------------------------
# Device-side forward (jitted): kernel 1 -> tiny density glue -> kernel 2.
# ----------------------------------------------------------------------------
@partial(jax.jit, static_argnames=("k", "tile_n", "dens_temperature"))
def _device_forward(X, gid_col, gid_row, invc_col, counts_k,
                    srow_col, lrow_col, sgrp_row, lgrp_row,
                    *, k, tile_n, dens_temperature):
    bsz, n_views, d = X.shape
    n = n_views * bsz
    n_pad = gid_col.shape[0]
    k_pad = sgrp_row.shape[1]
    n_tiles = n_pad // tile_n

    # Contrast rows in (batch, view) order: a free row-major reshape of X, so the
    # feature tensor streams straight from its original HBM buffer (no transpose
    # copy, no D padding).  The loss is invariant to this row permutation.
    f = X.astype(jnp.float32).reshape(n, d)
    if n_pad > n:
        f = jnp.pad(f, ((0, n_pad - n), (0, 0)))

    cent, sumroot = pl.pallas_call(
        partial(_group_stats_kernel, k_pad=k_pad),
        grid=(2, n_tiles),
        in_specs=[
            pl.BlockSpec((tile_n, 1), lambda p, t: (t, 0)),      # group id (column)
            pl.BlockSpec((1, tile_n), lambda p, t: (0, t)),      # group id (row)
            pl.BlockSpec((tile_n, d), lambda p, t: (t, 0)),      # features, full D
            pl.BlockSpec((k_pad, 1), lambda p, t: (0, 0)),       # 1/count per group
        ],
        out_specs=[
            pl.BlockSpec((k_pad, d), lambda p, t: (0, 0)),       # centroid accumulator
            pl.BlockSpec((k_pad, 1), lambda p, t: (0, 0)),       # sum of dist**0.5
        ],
        out_shape=[
            jax.ShapeDtypeStruct((k_pad, d), jnp.float32),
            jax.ShapeDtypeStruct((k_pad, 1), jnp.float32),
        ],
        compiler_params=pltpu.CompilerParams(
            dimension_semantics=("arbitrary", "arbitrary"),
            vmem_limit_bytes=_VMEM_LIMIT),
    )(gid_col, gid_row, f, invc_col)

    # ---- density post-processing (tiny K-length vector; plain-JAX glue —
    # quantile clipping has no useful Pallas equivalent)
    sumroot_k = sumroot[:k, 0]
    dens_raw = (sumroot_k / counts_k) / jnp.log(counts_k + 10.0)
    multi = counts_k > 1.0
    density = jnp.where(multi, dens_raw, 0.0)
    density = jnp.where(multi, density, jnp.max(density))
    density = jnp.clip(density, jnp.quantile(density, 0.1), jnp.quantile(density, 0.9))
    density = dens_temperature * density / jnp.mean(density)

    # fold 1/density into the transposed centroid: (f . c_k)/d_k == f . (c_k/d_k),
    # delivered to kernel 2 as a lane-major bf16 [D, K_pad] MXU operand.
    inv_dens = jnp.ones((k_pad,), jnp.float32).at[:k].set(1.0 / density)
    cent_t_scaled = (cent * inv_dens[:, None]).T.astype(jnp.bfloat16)    # [D, K_pad]

    loss = pl.pallas_call(
        partial(_sim_ce_loss_kernel, k=k, k_pad=k_pad),
        grid=(n_tiles,),
        in_specs=[
            pl.BlockSpec((tile_n, d), lambda t: (t, 0)),
            pl.BlockSpec((d, k_pad), lambda t: (0, 0)),
            pl.BlockSpec((tile_n, 1), lambda t: (t, 0)),
            pl.BlockSpec((tile_n, 1), lambda t: (t, 0)),
            pl.BlockSpec((1, k_pad), lambda t: (0, 0)),
            pl.BlockSpec((1, k_pad), lambda t: (0, 0)),
        ],
        out_specs=pl.BlockSpec((1, 1), lambda t: (0, 0)),
        out_shape=jax.ShapeDtypeStruct((1, 1), jnp.float32),
        scratch_shapes=[pltpu.VMEM((1, 1), jnp.float32),
                        pltpu.VMEM((1, 1), jnp.float32)],
        compiler_params=pltpu.CompilerParams(
            dimension_semantics=("arbitrary",),
            vmem_limit_bytes=_VMEM_LIMIT),
    )(f, cent_t_scaled, srow_col, lrow_col, sgrp_row, lgrp_row)

    return loss[0, 0]


# ----------------------------------------------------------------------------
# Host-side wrapper: data-dependent group discovery (cached) + tiny int metadata.
# ----------------------------------------------------------------------------
_GROUP_CACHE = {}


def _discover_groups(subject, labels):
    # TODO(synk): torch.unique-style dynamic grouping has no static-shape Pallas
    # equivalent; it runs on the host and is cached (depends only on subject/labels).
    key = (subject.tobytes(), labels.tobytes(), int(subject.shape[0]))
    hit = _GROUP_CACHE.get(key)
    if hit is not None:
        return hit
    bsz = subject.shape[0]
    group_of_batchrow = np.full(bsz, -1, np.int32)
    sub_idx, lab_idx, counts = [], [], []
    g = 0
    for i, sub in enumerate(np.unique(subject)):
        for j, lab in enumerate(np.unique(labels[subject == sub])):
            rows = np.where((subject == sub) & (labels == lab))[0]
            group_of_batchrow[rows] = g
            sub_idx.append(i)
            lab_idx.append(j)
            counts.append(2 * len(rows))     # both views of a batch row share a group
            g += 1
    res = (group_of_batchrow,
           np.asarray(sub_idx, np.int32),
           np.asarray(lab_idx, np.int32),
           np.asarray(counts, np.float32))
    _GROUP_CACHE[key] = res
    return res


def _select_tile(n, d, k_pad):
    """Largest N-tile (target 512) whose working set fits a ~24 MiB budget."""
    n8 = _round_up(max(n, 8), 8)
    if n8 <= 512:
        return n8, n8                                   # single tile == full array
    budget = 24 * 1024 * 1024
    fixed = 2 * k_pad * max(d, 128) * 4 + 2 * d * k_pad * 2 + (1 << 20)
    for tn in (512, 256, 128):                          # multiples of 128 (lane-legal)
        if fixed + 2 * tn * d * 4 + 6 * tn * 512 <= budget:
            return tn, _round_up(n, tn)
    return 128, _round_up(n, 128)


def inter_sub_sim_v2_forward(X_data, subject, labels, dens_temperature=DENS_TEMPERATURE):
    X = jnp.asarray(X_data)
    bsz, n_views, d = X.shape
    assert n_views == 2, "module semantics (cat(subject, subject)) require 2 views"
    n = n_views * bsz

    subject_np = np.asarray(subject)
    labels_np = np.asarray(labels)
    group_of_batchrow, sub_idx, lab_idx, counts = _discover_groups(subject_np, labels_np)
    k = int(sub_idx.shape[0])
    k_pad = _round_up(k, 128)
    tile_n, n_pad = _select_tile(n, int(d), k_pad)

    # contrast-row metadata in (batch, view) order: each batch row repeated per view
    gid_rows = np.repeat(group_of_batchrow, n_views).astype(np.int32)
    s_rows = np.repeat(subject_np.astype(np.int32), n_views)
    l_rows = np.repeat(labels_np.astype(np.int32), n_views)

    # tiny integer / scalar side inputs (O(N)+O(K) int32, not O(N*K) f32)
    gid_col = np.full((n_pad, 1), -1, np.int32)
    gid_col[:n, 0] = gid_rows
    gid_row = np.ascontiguousarray(gid_col.reshape(1, n_pad))
    srow = np.full((n_pad, 1), -1, np.int32)
    srow[:n, 0] = s_rows
    lrow = np.full((n_pad, 1), -1, np.int32)
    lrow[:n, 0] = l_rows
    sgrp = np.full((1, k_pad), -1, np.int32)
    sgrp[0, :k] = sub_idx
    lgrp = np.full((1, k_pad), -1, np.int32)
    lgrp[0, :k] = lab_idx
    invc = np.zeros((k_pad, 1), np.float32)
    invc[:k, 0] = 1.0 / counts

    return _device_forward(X, jnp.asarray(gid_col), jnp.asarray(gid_row),
                           jnp.asarray(invc), jnp.asarray(counts),
                           jnp.asarray(srow), jnp.asarray(lrow),
                           jnp.asarray(sgrp), jnp.asarray(lgrp),
                           k=k, tile_n=tile_n,
                           dens_temperature=float(dens_temperature))


# ----------------------------------------------------------------------------
# Pure NumPy mirror of the PyTorch forward (for validation).
# ----------------------------------------------------------------------------
def reference_loss(X_data, subject, labels, dens_temperature):
    X = np.asarray(X_data, np.float32)
    bsz, n_views, D = X.shape
    contrast_count = n_views
    contrast_feature = np.transpose(X, (1, 0, 2)).reshape(n_views * bsz, D)
    subject_ten = np.concatenate([subject, subject])
    labels_ten = np.concatenate([labels, labels])

    centroid_list, dist_list, subject_list, labels_list = [], [], [], []
    for i, sub in enumerate(np.unique(subject_ten)):
        labs = np.unique(labels_ten[subject_ten == sub])
        for j, lab in enumerate(labs):
            rows = np.where((subject_ten == sub) & (labels_ten == lab))[0]
            Xg = contrast_feature[rows, :]
            cen = Xg.mean(axis=0)
            dist = np.sqrt(((Xg - cen) ** 2).sum(axis=1))
            centroid_list.append(cen)
            dist_list.append(dist)
            subject_list.append(i)
            labels_list.append(j)
    centroid = np.stack(centroid_list)
    k = len(dist_list)
    density = np.zeros(k, np.float32)
    for i, dist in enumerate(dist_list):
        if len(dist) > 1:
            density[i] = (dist ** 0.5).mean() / np.log(len(dist) + 10)
    dmax = density.max()
    for i, dist in enumerate(dist_list):
        if len(dist) <= 1:
            density[i] = dmax
    density = np.clip(density, np.quantile(density, 0.1), np.quantile(density, 0.9))
    density = dens_temperature * density / density.mean()

    subj_col = subject.reshape(-1, 1)
    lab_col = labels.reshape(-1, 1)
    subject_eq = (subj_col == np.array(subject_list)).astype(np.float32)
    subject_mask = np.tile(np.where(subject_eq == 1, 0.0, 1.0), (contrast_count, 1))
    labels_mask = np.tile((lab_col == np.array(labels_list)).astype(np.float32),
                          (contrast_count, 1))
    mask = subject_mask * labels_mask
    nz = np.where(mask.sum(1) != 0)[0]
    mask = mask[nz]
    sim = contrast_feature @ centroid.T / density
    sim = sim - sim.max(axis=1, keepdims=True)
    sim = sim[nz]
    same_subject_mask = np.tile(subject_eq, (contrast_count, 1))
    logit_mask = np.where(same_subject_mask * labels_mask == 1, 0.0, 1.0)[nz]
    sim = sim * logit_mask
    logZ = np.log(np.exp(sim).sum(axis=1))
    ce = (mask * (logZ[:, None] - sim)).sum(axis=1)
    loss = ce / mask.sum(1)
    return loss.reshape(contrast_count, mask.shape[0] // 2).mean()


if __name__ == "__main__":
    key = jax.random.PRNGKey(0)
    bsz, n_views, hidden = 8, 2, 32
    X_data = jax.random.normal(key, (bsz, n_views, hidden), dtype=jnp.float32) * 0.5
    subject = np.array([0, 0, 0, 0, 1, 1, 1, 1], dtype=np.int32)
    labels = np.array([0, 1, 2, 0, 0, 1, 2, 1], dtype=np.int32)

    loss = inter_sub_sim_v2_forward(X_data, subject, labels, DENS_TEMPERATURE)
    loss = jax.block_until_ready(loss)

    ref = reference_loss(np.asarray(X_data), subject, labels, DENS_TEMPERATURE)
    assert np.isfinite(float(loss))
    np.testing.assert_allclose(float(loss), float(ref), rtol=5e-2, atol=5e-2)
    print("KERNEL_OK")
</pallas_src>

<mosaic_0001>
module attributes {stable_mosaic.version = 11 : i64} {
  func.func @_group_stats_kernel(%arg0: i32, %arg1: i32, %arg2: memref<16x1xi32, #tpu.memory_space<vmem>>, %arg3: memref<1x16xi32, #tpu.memory_space<vmem>>, %arg4: memref<16x32xf32, #tpu.memory_space<vmem>>, %arg5: memref<128x1xf32, #tpu.memory_space<vmem>>, %arg6: memref<128x32xf32, #tpu.memory_space<vmem>>, %arg7: memref<128x1xf32, #tpu.memory_space<vmem>>) attributes {dimension_semantics = [#tpu.dimension_semantics<arbitrary>, #tpu.dimension_semantics<arbitrary>], iteration_bounds = array<i64: 2, 1>, scalar_prefetch = 0 : i64, scratch_operands = 0 : i64, tpu.core_type = #tpu.core_type<tc>, window_params = [{transform_indices = @transform_0, window_bounds = array<i64: 16, 1>}, {transform_indices = @transform_1, window_bounds = array<i64: 1, 16>}, {transform_indices = @transform_2, window_bounds = array<i64: 16, 32>}, {pipeline_mode = #tpu.pipeline_mode<synchronous>, transform_indices = @transform_3, window_bounds = array<i64: 128, 1>}, {pipeline_mode = #tpu.pipeline_mode<synchronous>, transform_indices = @transform_4, window_bounds = array<i64: 128, 32>}, {pipeline_mode = #tpu.pipeline_mode<synchronous>, transform_indices = @transform_5, window_bounds = array<i64: 128, 1>}]} {
    %c0 = arith.constant 0 : index
    %c0_0 = arith.constant 0 : index
    %0 = vector.load %arg4[%c0, %c0_0] : memref<16x32xf32, #tpu.memory_space<vmem>>, vector<16x32xf32>
    %c0_i32 = arith.constant 0 : i32
    %1 = arith.cmpi eq, %arg0, %c0_i32 : i32
    %c0_i32_1 = arith.constant 0 : i32
    %2 = arith.cmpi eq, %arg1, %c0_i32_1 : i32
    %3 = arith.andi %1, %2 : i1
    %4 = arith.extui %3 : i1 to i32
    %c0_i32_2 = arith.constant 0 : i32
    %5 = arith.cmpi ne, %4, %c0_i32_2 : i32
    scf.if %5 {
      %cst = arith.constant 0.000000e+00 : f32
      %17 = vector.broadcast %cst : f32 to vector<128x32xf32>
      %c0_9 = arith.constant 0 : index
      %c0_10 = arith.constant 0 : index
      %18 = vector.load %arg6[%c0_9, %c0_10] : memref<128x32xf32, #tpu.memory_space<vmem>>, vector<128x32xf32>
      tpu.vector_store %arg6[%c0_9, %c0_10], %17 {strides = array<i32>} : memref<128x32xf32, #tpu.memory_space<vmem>>, vector<128x32xf32>,
      %cst_11 = arith.constant 0.000000e+00 : f32
      %19 = vector.broadcast %cst_11 : f32 to vector<128x1xf32>
      %c0_12 = arith.constant 0 : index
      %c0_13 = arith.constant 0 : index
      %20 = vector.load %arg7[%c0_12, %c0_13] : memref<128x1xf32, #tpu.memory_space<vmem>>, vector<128x1xf32>
      tpu.vector_store %arg7[%c0_12, %c0_13], %19 {strides = array<i32>} : memref<128x1xf32, #tpu.memory_space<vmem>>, vector<128x1xf32>,
    } else {
    }
    %c0_i32_3 = arith.constant 0 : i32
    %6 = arith.cmpi eq, %arg0, %c0_i32_3 : i32
    %7 = arith.extui %6 : i1 to i32
    %c0_i32_4 = arith.constant 0 : i32
    %8 = arith.cmpi ne, %7, %c0_i32_4 : i32
    scf.if %8 {
      %17 = tpu.iota {dimensions = array<i32: 0>} : vector<128x16xi32>
      %c0_9 = arith.constant 0 : index
      %c0_10 = arith.constant 0 : index
      %18 = vector.load %arg3[%c0_9, %c0_10] : memref<1x16xi32, #tpu.memory_space<vmem>>, vector<1x16xi32>
      %19 = vector.broadcast %18 : vector<1x16xi32> to vector<128x16xi32>
      %20 = arith.cmpi eq, %17, %19 : vector<128x16xi32>
      %21 = arith.extui %20 : vector<128x16xi1> to vector<128x16xi32>
      %22 = arith.sitofp %21 : vector<128x16xi32> to vector<128x16xf32>
      %23 = arith.truncf %22 : vector<128x16xf32> to vector<128x16xbf16>
      %c0_11 = arith.constant 0 : index
      %c0_12 = arith.constant 0 : index
      %24 = vector.load %arg6[%c0_11, %c0_12] : memref<128x32xf32, #tpu.memory_space<vmem>>, vector<128x32xf32>
      %25 = arith.truncf %0 : vector<16x32xf32> to vector<16x32xbf16>
      %cst = arith.constant dense<0.000000e+00> : vector<128x32xf32>
      %26 = tpu.matmul %23, %25, %cst {dimension_numbers = #tpu.dot_dimension_numbers<[1], [0], [0], [1], [0, 0, 1, 1], [], []>} : vector<128x16xbf16>, vector<16x32xbf16>, vector<128x32xf32> -> vector<128x32xf32>
      %27 = arith.addf %24, %26 : vector<128x32xf32>
      %c0_13 = arith.constant 0 : index
      %c0_14 = arith.constant 0 : index
      %28 = vector.load %arg6[%c0_13, %c0_14] : memref<128x32xf32, #tpu.memory_space<vmem>>, vector<128x32xf32>
      tpu.vector_store %arg6[%c0_13, %c0_14], %27 {strides = array<i32>} : memref<128x32xf32, #tpu.memory_space<vmem>>, vector<128x32xf32>,
    } else {
    }
    %c0_i32_5 = arith.constant 0 : i32
    %9 = arith.cmpi eq, %arg0, %c0_i32_5 : i32
    %c0_i32_6 = arith.constant 0 : i32
    %10 = arith.cmpi eq, %arg1, %c0_i32_6 : i32
    %11 = arith.andi %9, %10 : i1
    %12 = arith.extui %11 : i1 to i32
    %c0_i32_7 = arith.constant 0 : i32
    %13 = arith.cmpi ne, %12, %c0_i32_7 : i32
    scf.if %13 {
      %c0_9 = arith.constant 0 : index
      %c0_10 = arith.constant 0 : index
      %17 = vector.load %arg6[%c0_9, %c0_10] : memref<128x32xf32, #tpu.memory_space<vmem>>, vector<128x32xf32>
      %c0_11 = arith.constant 0 : index
      %c0_12 = arith.constant 0 : index
      %18 = vector.load %arg5[%c0_11, %c0_12] : memref<128x1xf32, #tpu.memory_space<vmem>>, vector<128x1xf32>
      %19 = vector.broadcast %18 : vector<128x1xf32> to vector<128x32xf32>
      %20 = arith.mulf %17, %19 : vector<128x32xf32>
      %c0_13 = arith.constant 0 : index
      %c0_14 = arith.constant 0 : index
      %21 = vector.load %arg6[%c0_13, %c0_14] : memref<128x32xf32, #tpu.memory_space<vmem>>, vector<128x32xf32>
      tpu.vector_store %arg6[%c0_13, %c0_14], %20 {strides = array<i32>} : memref<128x32xf32, #tpu.memory_space<vmem>>, vector<128x32xf32>,
    } else {
    }
    %c1_i32 = arith.constant 1 : i32
    %14 = arith.cmpi eq, %arg0, %c1_i32 : i32
    %15 = arith.extui %14 : i1 to i32
    %c0_i32_8 = arith.constant 0 : i32
    %16 = arith.cmpi ne, %15, %c0_i32_8 : i32
    scf.if %16 {
      %17 = tpu.iota {dimensions = array<i32: 1>} : vector<16x128xi32>
      %c0_9 = arith.constant 0 : index
      %c0_10 = arith.constant 0 : index
      %18 = vector.load %arg2[%c0_9, %c0_10] : memref<16x1xi32, #tpu.memory_space<vmem>>, vector<16x1xi32>
      %19 = vector.broadcast %18 : vector<16x1xi32> to vector<16x128xi32>
      %20 = arith.cmpi eq, %17, %19 : vector<16x128xi32>
      %21 = arith.extui %20 : vector<16x128xi1> to vector<16x128xi32>
      %22 = arith.sitofp %21 : vector<16x128xi32> to vector<16x128xf32>
      %23 = arith.truncf %22 : vector<16x128xf32> to vector<16x128xbf16>
      %c0_11 = arith.constant 0 : index
      %c0_12 = arith.constant 0 : index
      %24 = vector.load %arg6[%c0_11, %c0_12] : memref<128x32xf32, #tpu.memory_space<vmem>>, vector<128x32xf32>
      %25 = arith.truncf %24 : vector<128x32xf32> to vector<128x32xbf16>
      %cst = arith.constant dense<0.000000e+00> : vector<16x32xf32>
      %26 = tpu.matmul %23, %25, %cst {dimension_numbers = #tpu.dot_dimension_numbers<[1], [0], [0], [1], [0, 0, 1, 1], [], []>} : vector<16x128xbf16>, vector<128x32xbf16>, vector<16x32xf32> -> vector<16x32xf32>
      %27 = arith.subf %0, %26 : vector<16x32xf32>
      %28 = arith.mulf %27, %27 : vector<16x32xf32>
      %cst_13 = arith.constant dense<0.000000e+00> : vector<16xf32>
      %29 = vector.multi_reduction <add>, %28, %cst_13 [1] : vector<16x32xf32> to vector<16xf32>
      %30 = vector.shape_cast %29 : vector<16xf32> to vector<16x1xf32>
      %cst_14 = arith.constant 0.000000e+00 : f32
      %31 = vector.broadcast %cst_14 : f32 to vector<16x1xf32>
      %32 = arith.maximumf %30, %31 : vector<16x1xf32>
      %33 = math.sqrt %32 : vector<16x1xf32>
      %34 = math.sqrt %33 : vector<16x1xf32>
      %35 = tpu.iota {dimensions = array<i32: 0>} : vector<128x16xi32>
      %c0_15 = arith.constant 0 : index
      %c0_16 = arith.constant 0 : index
      %36 = vector.load %arg3[%c0_15, %c0_16] : memref<1x16xi32, #tpu.memory_space<vmem>>, vector<1x16xi32>
      %37 = vector.broadcast %36 : vector<1x16xi32> to vector<128x16xi32>
      %38 = arith.cmpi eq, %35, %37 : vector<128x16xi32>
      %39 = arith.extui %38 : vector<128x16xi1> to vector<128x16xi32>
      %40 = arith.sitofp %39 : vector<128x16xi32> to vector<128x16xf32>
      %41 = arith.truncf %40 : vector<128x16xf32> to vector<128x16xbf16>
      %c0_17 = arith.constant 0 : index
      %c0_18 = arith.constant 0 : index
      %42 = vector.load %arg7[%c0_17, %c0_18] : memref<128x1xf32, #tpu.memory_space<vmem>>, vector<128x1xf32>
      %43 = arith.truncf %34 : vector<16x1xf32> to vector<16x1xbf16>
      %cst_19 = arith.constant dense<0.000000e+00> : vector<128x1xf32>
      %44 = tpu.matmul %41, %43, %cst_19 {dimension_numbers = #tpu.dot_dimension_numbers<[1], [0], [0], [1], [0, 0, 1, 1], [], []>} : vector<128x16xbf16>, vector<16x1xbf16>, vector<128x1xf32> -> vector<128x1xf32>
      %45 = arith.addf %42, %44 : vector<128x1xf32>
      %c0_20 = arith.constant 0 : index
      %c0_21 = arith.constant 0 : index
      %46 = vector.load %arg7[%c0_20, %c0_21] : memref<128x1xf32, #tpu.memory_space<vmem>>, vector<128x1xf32>
      tpu.vector_store %arg7[%c0_20, %c0_21], %45 {strides = array<i32>} : memref<128x1xf32, #tpu.memory_space<vmem>>, vector<128x1xf32>,
    } else {
    }
    return
  }
  func.func @transform_0(%arg0: i32, %arg1: i32) -> (i32, i32) {
    %c0_i32 = arith.constant 0 : i32
    %c0_i32_0 = arith.constant 0 : i32
    return %arg1, %c0_i32 : i32, i32
  }
  func.func @transform_1(%arg0: i32, %arg1: i32) -> (i32, i32) {
    %c0_i32 = arith.constant 0 : i32
    %c0_i32_0 = arith.constant 0 : i32
    return %c0_i32, %arg1 : i32, i32
  }
  func.func @transform_2(%arg0: i32, %arg1: i32) -> (i32, i32) {
    %c0_i32 = arith.constant 0 : i32
    %c0_i32_0 = arith.constant 0 : i32
    return %arg1, %c0_i32 : i32, i32
  }
  func.func @transform_3(%arg0: i32, %arg1: i32) -> (i32, i32) {
    %c0_i32 = arith.constant 0 : i32
    %c0_i32_0 = arith.constant 0 : i32
    %c0_i32_1 = arith.constant 0 : i32
    return %c0_i32, %c0_i32_0 : i32, i32
  }
  func.func @transform_4(%arg0: i32, %arg1: i32) -> (i32, i32) {
    %c0_i32 = arith.constant 0 : i32
    %c0_i32_0 = arith.constant 0 : i32
    %c0_i32_1 = arith.constant 0 : i32
    return %c0_i32, %c0_i32_0 : i32, i32
  }
  func.func @transform_5(%arg0: i32, %arg1: i32) -> (i32, i32) {
    %c0_i32 = arith.constant 0 : i32
    %c0_i32_0 = arith.constant 0 : i32
    %c0_i32_1 = arith.constant 0 : i32
    return %c0_i32, %c0_i32_0 : i32, i32
  }
}

module attributes {stable_mosaic.version = 11 : i64} {
  func.func @_sim_ce_loss_kernel(%arg0: i32, %arg1: memref<16x32xf32, #tpu.memory_space<vmem>>, %arg2: memref<32x128xbf16, #tpu.memory_space<vmem>>, %arg3: memref<16x1xi32, #tpu.memory_space<vmem>>, %arg4: memref<16x1xi32, #tpu.memory_space<vmem>>, %arg5: memref<1x128xi32, #tpu.memory_space<vmem>>, %arg6: memref<1x128xi32, #tpu.memory_space<vmem>>, %arg7: memref<1x1xf32, #tpu.memory_space<vmem>>, %arg8: memref<1x1xf32, #tpu.memory_space<vmem>>, %arg9: memref<1x1xf32, #tpu.memory_space<vmem>>) attributes {dimension_semantics = [#tpu.dimension_semantics<arbitrary>], iteration_bounds = array<i64: 1>, scalar_prefetch = 0 : i64, scratch_operands = 2 : i64, tpu.core_type = #tpu.core_type<tc>, window_params = [{transform_indices = @transform_0, window_bounds = array<i64: 16, 32>}, {pipeline_mode = #tpu.pipeline_mode<synchronous>, transform_indices = @transform_1, window_bounds = array<i64: 32, 128>}, {transform_indices = @transform_2, window_bounds = array<i64: 16, 1>}, {transform_indices = @transform_3, window_bounds = array<i64: 16, 1>}, {pipeline_mode = #tpu.pipeline_mode<synchronous>, transform_indices = @transform_4, window_bounds = array<i64: 1, 128>}, {pipeline_mode = #tpu.pipeline_mode<synchronous>, transform_indices = @transform_5, window_bounds = array<i64: 1, 128>}, {pipeline_mode = #tpu.pipeline_mode<synchronous>, transform_indices = @transform_6, window_bounds = array<i64: 1, 1>}]} {
    %c0_i32 = arith.constant 0 : i32
    %0 = arith.cmpi eq, %arg0, %c0_i32 : i32
    %1 = arith.extui %0 : i1 to i32
    %c0_i32_0 = arith.constant 0 : i32
    %2 = arith.cmpi ne, %1, %c0_i32_0 : i32
    scf.if %2 {
      %cst_35 = arith.constant 0.000000e+00 : f32
      %77 = vector.broadcast %cst_35 : f32 to vector<1x1xf32>
      %c0_36 = arith.constant 0 : index
      %c0_37 = arith.constant 0 : index
      %78 = vector.load %arg8[%c0_36, %c0_37] : memref<1x1xf32, #tpu.memory_space<vmem>>, vector<1x1xf32>
      tpu.vector_store %arg8[%c0_36, %c0_37], %77 {strides = array<i32>} : memref<1x1xf32, #tpu.memory_space<vmem>>, vector<1x1xf32>,
      %cst_38 = arith.constant 0.000000e+00 : f32
      %79 = vector.broadcast %cst_38 : f32 to vector<1x1xf32>
      %c0_39 = arith.constant 0 : index
      %c0_40 = arith.constant 0 : index
      %80 = vector.load %arg9[%c0_39, %c0_40] : memref<1x1xf32, #tpu.memory_space<vmem>>, vector<1x1xf32>
      tpu.vector_store %arg9[%c0_39, %c0_40], %79 {strides = array<i32>} : memref<1x1xf32, #tpu.memory_space<vmem>>, vector<1x1xf32>,
    } else {
    }
    %c0 = arith.constant 0 : index
    %c0_1 = arith.constant 0 : index
    %3 = vector.load %arg1[%c0, %c0_1] : memref<16x32xf32, #tpu.memory_space<vmem>>, vector<16x32xf32>
    %4 = arith.truncf %3 : vector<16x32xf32> to vector<16x32xbf16>
    %c0_2 = arith.constant 0 : index
    %c0_3 = arith.constant 0 : index
    %5 = vector.load %arg2[%c0_2, %c0_3] : memref<32x128xbf16, #tpu.memory_space<vmem>>, vector<32x128xbf16>
    %cst = arith.constant dense<0.000000e+00> : vector<16x128xf32>
    %6 = tpu.matmul %4, %5, %cst {dimension_numbers = #tpu.dot_dimension_numbers<[1], [0], [0], [1], [0, 0, 1, 1], [], []>} : vector<16x32xbf16>, vector<32x128xbf16>, vector<16x128xf32> -> vector<16x128xf32>
    %c0_4 = arith.constant 0 : index
    %c0_5 = arith.constant 0 : index
    %7 = vector.load %arg3[%c0_4, %c0_5] : memref<16x1xi32, #tpu.memory_space<vmem>>, vector<16x1xi32>
    %c0_6 = arith.constant 0 : index
    %c0_7 = arith.constant 0 : index
    %8 = vector.load %arg4[%c0_6, %c0_7] : memref<16x1xi32, #tpu.memory_space<vmem>>, vector<16x1xi32>
    %c0_8 = arith.constant 0 : index
    %c0_9 = arith.constant 0 : index
    %9 = vector.load %arg5[%c0_8, %c0_9] : memref<1x128xi32, #tpu.memory_space<vmem>>, vector<1x128xi32>
    %c0_10 = arith.constant 0 : index
    %c0_11 = arith.constant 0 : index
    %10 = vector.load %arg6[%c0_10, %c0_11] : memref<1x128xi32, #tpu.memory_space<vmem>>, vector<1x128xi32>
    %11 = tpu.iota {dimensions = array<i32: 1>} : vector<1x128xi32>
    %c6_i32 = arith.constant 6 : i32
    %12 = vector.broadcast %c6_i32 : i32 to vector<1x128xi32>
    %13 = arith.cmpi slt, %11, %12 : vector<1x128xi32>
    %14 = vector.broadcast %7 : vector<16x1xi32> to vector<16x128xi32>
    %15 = vector.broadcast %9 : vector<1x128xi32> to vector<16x128xi32>
    %16 = arith.cmpi eq, %14, %15 : vector<16x128xi32>
    %17 = vector.broadcast %8 : vector<16x1xi32> to vector<16x128xi32>
    %18 = vector.broadcast %10 : vector<1x128xi32> to vector<16x128xi32>
    %19 = arith.cmpi eq, %17, %18 : vector<16x128xi32>
    %cst_12 = arith.constant dense<true> : vector<16x128xi1>
    %20 = arith.xori %16, %cst_12 : vector<16x128xi1>
    %21 = arith.andi %20, %19 : vector<16x128xi1>
    %22 = vector.broadcast %13 : vector<1x128xi1> to vector<16x128xi1>
    %23 = arith.andi %21, %22 : vector<16x128xi1>
    %24 = arith.extui %23 : vector<16x128xi1> to vector<16x128xi32>
    %25 = arith.sitofp %24 : vector<16x128xi32> to vector<16x128xf32>
    %26 = arith.andi %16, %19 : vector<16x128xi1>
    %cst_13 = arith.constant dense<true> : vector<16x128xi1>
    %27 = arith.xori %26, %cst_13 : vector<16x128xi1>
    %28 = vector.broadcast %13 : vector<1x128xi1> to vector<16x128xi1>
    %29 = arith.andi %27, %28 : vector<16x128xi1>
    %30 = arith.extui %29 : vector<16x128xi1> to vector<16x128xi32>
    %31 = arith.sitofp %30 : vector<16x128xi32> to vector<16x128xf32>
    %cst_14 = arith.constant -1.000000e+30 : f32
    %32 = vector.shape_cast %13 : vector<1x128xi1> to vector<1x128xi1>
    %33 = vector.broadcast %32 : vector<1x128xi1> to vector<16x128xi1>
    %34 = vector.broadcast %cst_14 : f32 to vector<16x128xf32>
    %35 = arith.select %33, %6, %34 : vector<16x128xi1>, vector<16x128xf32>
    %cst_15 = arith.constant dense<0xFF800000> : vector<16xf32>
    %36 = vector.multi_reduction <maximumf>, %35, %cst_15 [1] : vector<16x128xf32> to vector<16xf32>
    %37 = vector.shape_cast %36 : vector<16xf32> to vector<16x1xf32>
    %38 = vector.broadcast %37 : vector<16x1xf32> to vector<16x128xf32>
    %39 = arith.subf %6, %38 : vector<16x128xf32>
    %40 = arith.mulf %39, %31 : vector<16x128xf32>
    %41 = math.exp %40 : vector<16x128xf32>
    %cst_16 = arith.constant dense<0.000000e+00> : vector<16xf32>
    %42 = vector.multi_reduction <add>, %41, %cst_16 [1] : vector<16x128xf32> to vector<16xf32>
    %43 = vector.shape_cast %42 : vector<16xf32> to vector<16x1xf32>
    %cst_17 = arith.constant 1.220000e+02 : f32
    %44 = vector.broadcast %cst_17 : f32 to vector<16x1xf32>
    %45 = arith.subf %43, %44 : vector<16x1xf32>
    %46 = math.log %45 : vector<16x1xf32>
    %cst_18 = arith.constant dense<0.000000e+00> : vector<16xf32>
    %47 = vector.multi_reduction <add>, %25, %cst_18 [1] : vector<16x128xf32> to vector<16xf32>
    %48 = vector.shape_cast %47 : vector<16xf32> to vector<16x1xf32>
    %49 = arith.mulf %48, %46 : vector<16x1xf32>
    %50 = arith.mulf %25, %40 : vector<16x128xf32>
    %cst_19 = arith.constant dense<0.000000e+00> : vector<16xf32>
    %51 = vector.multi_reduction <add>, %50, %cst_19 [1] : vector<16x128xf32> to vector<16xf32>
    %52 = vector.shape_cast %51 : vector<16xf32> to vector<16x1xf32>
    %53 = arith.subf %49, %52 : vector<16x1xf32>
    %cst_20 = arith.constant 0.000000e+00 : f32
    %54 = vector.broadcast %cst_20 : f32 to vector<16x1xf32>
    %55 = arith.cmpf ogt, %48, %54 : vector<16x1xf32>
    %cst_21 = arith.constant 1.000000e+00 : f32
    %56 = vector.broadcast %cst_21 : f32 to vector<16x1xf32>
    %57 = arith.maximumf %48, %56 : vector<16x1xf32>
    %58 = tpu.reciprocal %57 {approx = true} : vector<16x1xf32> -> vector<16x1xf32>
    %59 = arith.mulf %53, %58 : vector<16x1xf32>
    %cst_22 = arith.constant 0.000000e+00 : f32
    %60 = vector.broadcast %cst_22 : f32 to vector<16x1xf32>
    %61 = arith.select %55, %59, %60 : vector<16x1xi1>, vector<16x1xf32>
    %c0_23 = arith.constant 0 : index
    %c0_24 = arith.constant 0 : index
    %62 = vector.load %arg8[%c0_23, %c0_24] : memref<1x1xf32, #tpu.memory_space<vmem>>, vector<1x1xf32>
    %cst_25 = arith.constant dense<0.000000e+00> : vector<1xf32>
    %63 = vector.multi_reduction <add>, %61, %cst_25 [0] : vector<16x1xf32> to vector<1xf32>
    %64 = vector.shape_cast %63 : vector<1xf32> to vector<1x1xf32>
    %65 = arith.addf %62, %64 : vector<1x1xf32>
    %c0_26 = arith.constant 0 : index
    %c0_27 = arith.constant 0 : index
    %66 = vector.load %arg8[%c0_26, %c0_27] : memref<1x1xf32, #tpu.memory_space<vmem>>, vector<1x1xf32>
    tpu.vector_store %arg8[%c0_26, %c0_27], %65 {strides = array<i32>} : memref<1x1xf32, #tpu.memory_space<vmem>>, vector<1x1xf32>,
    %c0_28 = arith.constant 0 : index
    %c0_29 = arith.constant 0 : index
    %67 = vector.load %arg9[%c0_28, %c0_29] : memref<1x1xf32, #tpu.memory_space<vmem>>, vector<1x1xf32>
    %68 = arith.extui %55 : vector<16x1xi1> to vector<16x1xi32>
    %69 = arith.sitofp %68 : vector<16x1xi32> to vector<16x1xf32>
    %cst_30 = arith.constant dense<0.000000e+00> : vector<1xf32>
    %70 = vector.multi_reduction <add>, %69, %cst_30 [0] : vector<16x1xf32> to vector<1xf32>
    %71 = vector.shape_cast %70 : vector<1xf32> to vector<1x1xf32>
    %72 = arith.addf %67, %71 : vector<1x1xf32>
    %c0_31 = arith.constant 0 : index
    %c0_32 = arith.constant 0 : index
    %73 = vector.load %arg9[%c0_31, %c0_32] : memref<1x1xf32, #tpu.memory_space<vmem>>, vector<1x1xf32>
    tpu.vector_store %arg9[%c0_31, %c0_32], %72 {strides = array<i32>} : memref<1x1xf32, #tpu.memory_space<vmem>>, vector<1x1xf32>,
    %c0_i32_33 = arith.constant 0 : i32
    %74 = arith.cmpi eq, %arg0, %c0_i32_33 : i32
    %75 = arith.extui %74 : i1 to i32
    %c0_i32_34 = arith.constant 0 : i32
    %76 = arith.cmpi ne, %75, %c0_i32_34 : i32
    scf.if %76 {
      %c0_35 = arith.constant 0 : index
      %c0_36 = arith.constant 0 : index
      %77 = vector.load %arg8[%c0_35, %c0_36] : memref<1x1xf32, #tpu.memory_space<vmem>>, vector<1x1xf32>
      %c0_37 = arith.constant 0 : index
      %c0_38 = arith.constant 0 : index
      %78 = vector.load %arg9[%c0_37, %c0_38] : memref<1x1xf32, #tpu.memory_space<vmem>>, vector<1x1xf32>
      %79 = tpu.reciprocal %78 {approx = true} : vector<1x1xf32> -> vector<1x1xf32>
      %80 = arith.mulf %77, %79 : vector<1x1xf32>
      %c0_39 = arith.constant 0 : index
      %c0_40 = arith.constant 0 : index
      %81 = vector.load %arg7[%c0_39, %c0_40] : memref<1x1xf32, #tpu.memory_space<vmem>>, vector<1x1xf32>
      tpu.vector_store %arg7[%c0_39, %c0_40], %80 {strides = array<i32>} : memref<1x1xf32, #tpu.memory_space<vmem>>, vector<1x1xf32>,
    } else {
    }
    return
  }
  func.func @transform_0(%arg0: i32) -> (i32, i32) {
    %c0_i32 = arith.constant 0 : i32
    %c0_i32_0 = arith.constant 0 : i32
    return %arg0, %c0_i32 : i32, i32
  }
  func.func @transform_1(%arg0: i32) -> (i32, i32) {
    %c0_i32 = arith.constant 0 : i32
    %c0_i32_0 = arith.constant 0 : i32
    %c0_i32_1 = arith.constant 0 : i32
    return %c0_i32, %c0_i32_0 : i32, i32
  }
  func.func @transform_2(%arg0: i32) -> (i32, i32) {
    %c0_i32 = arith.constant 0 : i32
    %c0_i32_0 = arith.constant 0 : i32
    return %arg0, %c0_i32 : i32, i32
  }
  func.func @transform_3(%arg0: i32) -> (i32, i32) {
    %c0_i32 = arith.constant 0 : i32
    %c0_i32_0 = arith.constant 0 : i32
    return %arg0, %c0_i32 : i32, i32
  }
  func.func @transform_4(%arg0: i32) -> (i32, i32) {
    %c0_i32 = arith.constant 0 : i32
    %c0_i32_0 = arith.constant 0 : i32
    %c0_i32_1 = arith.constant 0 : i32
    return %c0_i32, %c0_i32_0 : i32, i32
  }
  func.func @transform_5(%arg0: i32) -> (i32, i32) {
    %c0_i32 = arith.constant 0 : i32
    %c0_i32_0 = arith.constant 0 : i32
    %c0_i32_1 = arith.constant 0 : i32
    return %c0_i32, %c0_i32_0 : i32, i32
  }
  func.func @transform_6(%arg0: i32) -> (i32, i32) {
    %c0_i32 = arith.constant 0 : i32
    %c0_i32_0 = arith.constant 0 : i32
    %c0_i32_1 = arith.constant 0 : i32
    return %c0_i32, %c0_i32_0 : i32, i32
  }
}

</mosaic_0001>

<bundles_post_ra>
// kernel: _device_forward.3
= control target key start
LH: loop header
LB: loop body
LE: loop exit
PB: predicated region body
PF: predicated region fallthrough
CT: control target
= control target key end

     0   :  { %v282_v2 = vmov 0   ;;  %s391_s0 = inlined_call_operand.vmem [shape: f32[16,32], index: 0, kind: input, shape index: {}]   ;;  %s392_s1 = inlined_call_operand.vmem [shape: bf16[32,128], index: 1, kind: input, shape index: {}]   ;;  %s393_s2 = inlined_call_operand.vmem [shape: s32[16,1], index: 2, kind: input, shape index: {}]   ;;  %s394_s3 = inlined_call_operand.vmem [shape: s32[16,1], index: 3, kind: input, shape index: {}]   ;;  %s395_s4 = inlined_call_operand.vmem [shape: s32[1,128], index: 4, kind: input, shape index: {}]   ;;  %s396_s5 = inlined_call_operand.vmem [shape: s32[1,128], index: 5, kind: input, shape index: {}]   ;;  %s397_s6 = inlined_call_operand.hbm [shape: f32[1,1], index: 6, kind: output, shape index: {}]  }
   0x1   :  { %v233_v0 = vld [vmem:[%s392_s1 + $0x8] sm:$0xff]  ;;  %v232_v1 = vld [vmem:[%s392_s1] sm:$0xff]  ;;  %238 = vset.pattern.permute.xlu0 %v282_v2  ;;  %239 = vset.pattern.permute.xlu1 %v282_v2 }
   0x2   :  { %v69_v3 = vld [vmem:[%s393_s2] sm:$0xff]  ;;  %61 = vmatpush.bf16.msra.mxu0 %v233_v0  ;;  %v33_v6 = vld [vmem:[%s391_s0 + $0x8] sm:$0xff] }
   0x3   :  { %v71_v4 = vld [vmem:[%s394_s3] sm:$0xff]  ;;  %79 = vperm.xlu0 %238, %v69_v3  }
   0x4   :  { %v32_v5 = vld [vmem:[%s391_s0] sm:$0xff]  ;;  %88 = vperm.xlu1 %239, %v71_v4  }
   0x5   :  { %11 = vsyncpa [#allocation5], 0  ;;  %v34_v7 = vpack.c.bf16 %v33_v6, %v32_v5  ;;  %vm51_vm0 = vcmask 261120   ;;  %v70_v8 = vld [vmem:[%s393_s2 + $0x8] sm:$0xff]  ;;  %v75_v10 = vlaneseq  ;;  %v240_v11 = vld [vmem:[%s395_s4] ss:$0 sm:$0xff] }
   0x6   :  { %62 = vmatpush.bf16.msra.mxu0 %v232_v1  ;;  %v72_v9 = vld [vmem:[%s394_s3 + $0x8] sm:$0xff]  ;;  %v241_v12 = vld [vmem:[%s396_s5] ss:$0 sm:$0xff]  ;;  %vm283_vm5 = vmmov 1   ;;  %v284_v24 = vmov 0.0   ;;  %s285_s2 = smov [#allocation4]  }
   0x7   :  { %v76_v14 = vand.u32 127, %v75_v10  ;;  %s204_s3 = sshll.u32 %s285_s2, 4  ;;  %s206_s15 = sshll.u32 %s397_s6, 4  ;;  %s205_s3 = int_to_ptr.vmem [resolvable:$true] %s204_s3  ;;  %s207_s15 = int_to_ptr.hbm [resolvable:$true] %s206_s15 }
   0x9   :  { %223 = vmatmul.msk.bf16.vlgmr.msra.gmra.mxu0 %vm51_vm0, %v34_v7  ;;  %vm77_vm4 = vcmp.lt.s32.totalorder %v76_v14, 6 }
   0xb   :  { %82 = vperm.xlu0 %238, %v70_v8  }
   0xc   :  { %91 = vperm.xlu1 %239, %v72_v9  }
  0x75   :  { %v80_v13 = vpop.permute.xlu0 %79 }
  0x76   :  { %v89_v15 = vpop.permute.xlu1 %88  ;;  %vm85_vm1 = vcmp.eq.s32.totalorder %v80_v13, %v240_v11 }
  0x77   :  { %vm94_vm2 = vcmp.eq.s32.totalorder %v89_v15, %v241_v12  ;;  %vm96_vm13 = vmxor %vm85_vm1, %vm283_vm5 }
  0x78   :  { %vm108_vm3 = vmand %vm85_vm1, %vm94_vm2 }
  0x79   :  { %vm110_vm6 = vmxor %vm108_vm3, %vm283_vm5 }
  0x7a   :  { %vm355_vm7 = vmand %vm110_vm6, %vm77_vm4 }
  0x7b   :  { %vm98_vm14 = vmand %vm96_vm13, %vm94_vm2  ;;  %v226_v28 = vsel %vm355_vm7, 1.0, %v284_v24 }
  0x7c   :  { %vm102_vm15 = vmand %vm98_vm14, %vm77_vm4 }
  0x7d   :  { %v83_v17 = vpop.permute.xlu0 %82  ;;  %v224_v25 = vsel %vm102_vm15, 1.0, %v284_v24 }
  0x7e   :  { %v92_v18 = vpop.permute.xlu1 %91  ;;  %vm86_vm8 = vcmp.eq.s32.totalorder %v83_v17, %v240_v11 }
  0x7f   :  { %vm95_vm9 = vcmp.eq.s32.totalorder %v92_v18, %v241_v12  ;;  %vm97_vm0 = vmxor %vm86_vm8, %vm283_vm5 }
  0x80   :  { %vm109_vm10 = vmand %vm86_vm8, %vm95_vm9 }
  0x81   :  { %vm111_vm11 = vmxor %vm109_vm10, %vm283_vm5 }
  0x82   :  { %vm362_vm12 = vmand %vm111_vm11, %vm77_vm4 }
  0x83   :  { %vm99_vm3 = vmand %vm97_vm0, %vm95_vm9  ;;  %v227_v35 = vsel %vm362_vm12, 1.0, %v284_v24 }
  0x84   :  { %vm103_vm6 = vmand %vm99_vm3, %vm77_vm4 }
  0x85   :  { %v225_v26 = vsel %vm103_vm6, 1.0, %v284_v24 }
  0x86   :  { %v64_v20 = vpop.f32.mrf.mxu0 }
  0x87   :  { %v118_v21 = vsel %vm77_vm4, %v64_v20, -1e+30 }
  0x88   :  { %120 = vmax.xlane.f32.xlu2 %v118_v21 }
  0x8e   :  { %v66_v22 = vpop.f32.mrf.mxu0 }
  0x8f   :  { %v119_v23 = vsel %vm77_vm4, %v66_v22, -1e+30  ;;  %vm29_vm4 = vcmask 0  }
  0x90   :  { %122 = vmax.xlane.f32.xlu2 %v119_v23  ;;  %30 = vst.msk [vmem:[#allocation2] sm:$0x1] %vm29_vm4, %v284_v24 }
  0x91   :  { %31 = vst.msk [vmem:[#allocation3] sm:$0x1] %vm29_vm4, %v284_v24 }
  0x97   :  { %v166_v18 = vld [vmem:[#allocation2] sm:$0x1] }
  0x98   :  { %142 = vadd.xlane.f32.xlu2 %v224_v25  ;;  %v177_v52 = vld [vmem:[#allocation3] sm:$0x1] }
  0xa0   :  { %144 = vadd.xlane.f32.xlu2 %v225_v26 }
  0xfb   :  { %v121_v27 = vpop.xlane.xlu2 %120 }
  0xfc   :  { %v124_v29 = vsub.f32 %v64_v20, %v121_v27 }
  0xfe   :  { %v126_v30 = vmul.f32 %v226_v28, %v124_v29 }
 0x100   :  { %v128_v31 = vmul.f32 1.442695, %v126_v30  ;;  %v148_v32 = vmul.f32 %v224_v25, %v126_v30 }
 0x102   :  { %242 = vpow2.f32 %v128_v31  ;;  %150 = vadd.xlane.f32.xlu2 %v148_v32 }
 0x103   :  { %v123_v33 = vpop.xlane.xlu2 %122 }
 0x104   :  { %v125_v34 = vsub.f32 %v66_v22, %v123_v33 }
 0x106   :  { %v127_v36 = vmul.f32 %v227_v35, %v125_v34 }
 0x108   :  { %v243_v37 = vpop.eup %242  ;;  %v130_v38 = vmul.f32 1.442695, %v127_v36  ;;  %v149_v39 = vmul.f32 %v225_v26, %v127_v36 }
 0x109   :  { %132 = vadd.xlane.f32.xlu0 %v243_v37 }
 0x10a   :  { %244 = vpow2.f32 %v130_v38  ;;  %152 = vadd.xlane.f32.xlu2 %v149_v39 }
 0x10b   :  { %v143_v41 = vpop.xlane.xlu2 %142 }
 0x10c   :  { %vm156_vm1 = vcmp.gt.f32.partialorder %v143_v41, 0.0  ;;  %v158_v60 = vmax.f32 %v143_v41, 1.0 }
 0x10d   :  { %v230_v43 = vsel %vm156_vm1, 1.0, %v284_v24 }
 0x110   :  { %v245_v40 = vpop.eup %244 }
 0x111   :  { %134 = vadd.xlane.f32.xlu1 %v245_v40 }
 0x113   :  { %v145_v42 = vpop.xlane.xlu2 %144 }
 0x114   :  { %vm157_vm2 = vcmp.gt.f32.partialorder %v145_v42, 0.0  ;;  %v159_v62 = vmax.f32 %v145_v42, 1.0 }
 0x115   :  { %v231_v44 = vsel %vm157_vm2, 1.0, %v284_v24 }
 0x116   :  { %v182_v45 = vadd.f32 %v231_v44, %v230_v43 }
 0x118   :  { %v183_v46 = vrot.slane %v182_v45, 4 }
 0x11a   :  { %v184_v47 = vadd.f32 %v183_v46, %v182_v45 }
 0x11c   :  { %v185_v48 = vrot.slane %v184_v47, 2 }
 0x11e   :  { %v186_v49 = vadd.f32 %v185_v48, %v184_v47 }
 0x120   :  { %v187_v50 = vrot.slane %v186_v49, 1 }
 0x122   :  { %v188_v51 = vadd.f32 %v187_v50, %v186_v49 }
 0x124   :  { %v189_v53 = vadd.f32 %v188_v51, %v177_v52 }
 0x126   :  { %190 = vst.msk [vmem:[#allocation3] sm:$0x1] %vm29_vm4, %v189_v53 }
 0x12d   :  { %v195_v21 = vld [vmem:[#allocation3] sm:$0x1] }
 0x175   :  { %v151_v61 = vpop.xlane.xlu2 %150 }
 0x17c   :  { %v133_v54 = vpop.xlane.xlu0 %132 }
 0x17d   :  { %v228_v55 = vadd.f32 -122.0, %v133_v54  ;;  %v153_v5 = vpop.xlane.xlu2 %152 }
 0x17f   :  { %246 = vlog2.f32 %v228_v55 }
 0x184   :  { %v135_v56 = vpop.xlane.xlu1 %134 }
 0x185   :  { %v247_v57 = vpop.eup %246  ;;  %v229_v58 = vadd.f32 -122.0, %v135_v56 }
 0x186   :  { %v139_v59 = vmul.f32 0.6931472, %v247_v57 }
 0x187   :  { %248 = vlog2.f32 %v229_v58 }
 0x188   :  { %v146_v63 = vmul.f32 %v143_v41, %v139_v59  ;;  %250 = vrcp.f32 %v158_v60 }
 0x189   :  { %252 = vrcp.f32 %v159_v62 }
 0x18a   :  { %v154_v1 = vsub.f32 %v146_v63, %v151_v61  ;;  %254 = vrcp.f32 %v195_v21 }
 0x18d   :  { %v249_v0 = vpop.eup %248 }
 0x18e   :  { %v141_v2 = vmul.f32 0.6931472, %v249_v0  ;;  %v251_v4 = vpop.eup %250 }
 0x18f   :  { %v162_v6 = vmul.f32 %v251_v4, %v154_v1  ;;  %v253_v8 = vpop.eup %252 }
 0x190   :  { %v147_v3 = vmul.f32 %v145_v42, %v141_v2  ;;  %v255_v22 = vpop.eup %254 }
 0x191   :  { %v164_v10 = vsel %vm156_vm1, %v162_v6, 0.0 }
 0x192   :  { %v155_v7 = vsub.f32 %v147_v3, %v153_v5 }
 0x194   :  { %v163_v9 = vmul.f32 %v253_v8, %v155_v7 }
 0x196   :  { %v165_v11 = vsel %vm157_vm2, %v163_v9, 0.0 }
 0x197   :  { %v167_v12 = vadd.f32 %v165_v11, %v164_v10 }
 0x199   :  { %v168_v13 = vrot.slane %v167_v12, 4 }
 0x19b   :  { %v169_v14 = vadd.f32 %v168_v13, %v167_v12 }
 0x19d   :  { %v170_v15 = vrot.slane %v169_v14, 2 }
 0x19f   :  { %v171_v16 = vadd.f32 %v170_v15, %v169_v14 }
 0x1a1   :  { %v172_v17 = vrot.slane %v171_v16, 1 }
 0x1a3   :  { %v173_v19 = vadd.f32 %v172_v17, %v171_v16 }
 0x1a5   :  { %v174_v20 = vadd.f32 %v173_v19, %v166_v18 }
 0x1a7   :  { %176 = vst.msk [vmem:[#allocation2] sm:$0x1] %vm29_vm4, %v174_v20 }
 0x1ae   :  { %v194_v23 = vld [vmem:[#allocation2] sm:$0x1] }
 0x1af   :  { %v197_v24 = vmul.f32 %v255_v22, %v194_v23 }
 0x1b1   :  { %198 = vst.msk [vmem:[#allocation4] sm:$0x1] %vm29_vm4, %v197_v24 }
 0x1b2   :  { %209 = dma.vmem_to_hbm [thread:$0]  %s205_s3, 16, %s207_s15, [#allocation5]  }
 0x1b3   :  { %280 = dma.done.wait [#allocation5], 16  }
 0x1b4   :  { %281 = vsyncadd [#allocation5], 4294967280 }
 0x1b5   :  { %214 = vsyncpa [#allocation5], 1 }

// kernel: _device_forward.2
= control target key start
LH: loop header
LB: loop body
LE: loop exit
PB: predicated region body
PF: predicated region fallthrough
CT: control target
= control target key end

     0   :  { %s1215_s18 = smov 0   ;;  %s1217_s19 = smov 0   ;;  %s1908_s0 = inlined_call_operand.vmem [shape: s32[16,1], index: 0, kind: input, shape index: {}]   ;;  %s1909_s1 = inlined_call_operand.vmem [shape: s32[1,16], index: 1, kind: input, shape index: {}]   ;;  %s1910_s2 = inlined_call_operand.vmem [shape: f32[16,32], index: 2, kind: input, shape index: {}]   ;;  %s1911_s3 = inlined_call_operand.vmem [shape: f32[128,1], index: 3, kind: input, shape index: {}]   ;;  %s1912_s4 = inlined_call_operand.vmem [shape: f32[128,32], index: 4, kind: output, shape index: {0}]   ;;  %s1913_s5 = inlined_call_operand.vmem [shape: f32[128,1], index: 5, kind: output, shape index: {1}]  }
   0x1   :  { %s1219_s20 = smov 0  }
   0x2 LB: > { %s28_s21 = sadd.s32 1, %s1173_s19  ;;  %p1047_p0 = scmp.ge.s32.totalorder %s1177_s20, 1  ;;  %s1177_s20 = sphi %s1219_s20, %s16_s20   ;;  %s1173_s19 = sphi %s1217_s19, %s1915_s19   ;;  %s1169_s18 = sphi %s1215_s18, %s1914_s18  }
   0x3   : > { %p30_p1 = scmp.ge.s32.totalorder %s28_s21, 2  ;;  %p212_p2 = scmp.lt.s32.totalorder %s1177_s20, 3 }
   0x5   : > { %s1917_s21 = smov (%p30_p1, %s28_s21), 0  ;;  %p213_p3 = pnand %p1047_p0, %p212_p2 }
   0x6   : > { %p261_p4 = scmp.eq.s32.totalorder (!%p213_p3), %s1169_s18, 0 }
   0x7   : > { %216 = sbr.rel (%p213_p3) target bundleno = 998 (0x3e6), region = 36 }
   0xc   : > { %v1238_v0 = vld [vmem:[%s1910_s2] sm:$0xff]  ;;  %v1243_v1 = vld [vmem:[%s1910_s2 + $0x8] sm:$0xff]  ;;  %266 = sbr.rel (!%p261_p4) target bundleno = 45 (0x2d), region = 40  ;;  %vm267_vm0 = vcmask (%p261_p4), 261120   ;;  %v1179_v2 = vmov (%p261_p4), 0.0   ;;  %vm284_vm1 = vcmask (%p261_p4), 7168  }
   0xd   : > { %268 = vst.msk [vmem:[%s1912_s4] sm:$0xff] (%p261_p4), %vm267_vm0, %v1179_v2 }
   0xe   : > { %269 = vst.msk [vmem:[%s1912_s4 + $0x8] sm:$0xff] (%p261_p4), %vm267_vm0, %v1179_v2 }
   0xf   : > { %270 = vst.msk [vmem:[%s1912_s4 + $0x10] sm:$0xff] (%p261_p4), %vm267_vm0, %v1179_v2 }
  0x10   : > { %271 = vst.msk [vmem:[%s1912_s4 + $0x18] sm:$0xff] (%p261_p4), %vm267_vm0, %v1179_v2 }
  0x11   : > { %272 = vst.msk [vmem:[%s1912_s4 + $0x20] sm:$0xff] %vm267_vm0, %v1179_v2 }
  0x12   : > { %273 = vst.msk [vmem:[%s1912_s4 + $0x28] sm:$0xff] %vm267_vm0, %v1179_v2 }
  0x13   : > { %274 = vst.msk [vmem:[%s1912_s4 + $0x30] sm:$0xff] %vm267_vm0, %v1179_v2 }
  0x14   : > { %275 = vst.msk [vmem:[%s1912_s4 + $0x38] sm:$0xff] %vm267_vm0, %v1179_v2 }
  0x15   : > { %276 = vst.msk [vmem:[%s1912_s4 + $0x40] sm:$0xff] %vm267_vm0, %v1179_v2 }
  0x16   : > { %277 = vst.msk [vmem:[%s1912_s4 + $0x48] sm:$0xff] %vm267_vm0, %v1179_v2 }
  0x17   : > { %278 = vst.msk [vmem:[%s1912_s4 + $0x50] sm:$0xff] %vm267_vm0, %v1179_v2 }
  0x18   : > { %279 = vst.msk [vmem:[%s1912_s4 + $0x58] sm:$0xff] %vm267_vm0, %v1179_v2 }
  0x19   : > { %280 = vst.msk [vmem:[%s1912_s4 + $0x60] sm:$0xff] %vm267_vm0, %v1179_v2 }
  0x1a   : > { %281 = vst.msk [vmem:[%s1912_s4 + $0x68] sm:$0xff] %vm267_vm0, %v1179_v2 }
  0x1b   : > { %282 = vst.msk [vmem:[%s1912_s4 + $0x70] sm:$0xff] %vm267_vm0, %v1179_v2 }
  0x1c   : > { %283 = vst.msk [vmem:[%s1912_s4 + $0x78] sm:$0xff] %vm267_vm0, %v1179_v2 }
  0x1d   : > { %285 = vst.msk [vmem:[%s1913_s5] sm:$0xff] %vm284_vm1, %v1179_v2 }
  0x1e   : > { %286 = vst.msk [vmem:[%s1913_s5 + $0x8] sm:$0xff] %vm284_vm1, %v1179_v2 }
  0x1f   : > { %287 = vst.msk [vmem:[%s1913_s5 + $0x10] sm:$0xff] %vm284_vm1, %v1179_v2 }
  0x20   : > { %288 = vst.msk [vmem:[%s1913_s5 + $0x18] sm:$0xff] %vm284_vm1, %v1179_v2 }
  0x21   : > { %289 = vst.msk [vmem:[%s1913_s5 + $0x20] sm:$0xff] %vm284_vm1, %v1179_v2 }
  0x22   : > { %290 = vst.msk [vmem:[%s1913_s5 + $0x28] sm:$0xff] %vm284_vm1, %v1179_v2 }
  0x23   : > { %291 = vst.msk [vmem:[%s1913_s5 + $0x30] sm:$0xff] %vm284_vm1, %v1179_v2 }
  0x24   : > { %292 = vst.msk [vmem:[%s1913_s5 + $0x38] sm:$0xff] %vm284_vm1, %v1179_v2 }
  0x25   : > { %293 = vst.msk [vmem:[%s1913_s5 + $0x40] sm:$0xff] %vm284_vm1, %v1179_v2 }
  0x26   : > { %294 = vst.msk [vmem:[%s1913_s5 + $0x48] sm:$0xff] %vm284_vm1, %v1179_v2 }
  0x27   : > { %295 = vst.msk [vmem:[%s1913_s5 + $0x50] sm:$0xff] %vm284_vm1, %v1179_v2 }
  0x28   : > { %296 = vst.msk [vmem:[%s1913_s5 + $0x58] sm:$0xff] %vm284_vm1, %v1179_v2 }
  0x29   : > { %297 = vst.msk [vmem:[%s1913_s5 + $0x60] sm:$0xff] %vm284_vm1, %v1179_v2 }
  0x2a   : > { %298 = vst.msk [vmem:[%s1913_s5 + $0x68] sm:$0xff] %vm284_vm1, %v1179_v2 }
  0x2b   : > { %299 = vst.msk [vmem:[%s1913_s5 + $0x70] sm:$0xff] %vm284_vm1, %v1179_v2 }
  0x2c   : > { %300 = vst.msk [vmem:[%s1913_s5 + $0x78] sm:$0xff] %vm284_vm1, %v1179_v2 }
  0x2d PF: > { %p1049_p5 = scmp.ne.s32.totalorder %s1169_s18, 0 }
  0x2f   : > { %303 = sbr.rel (%p1049_p5) target bundleno = 224 (0xe0), region = 44 }
  0x34   : > { %v395_v3 = vpack.c.bf16 %v1243_v1, %v1238_v0  ;;  %v304_v4 = vlaneseq  ;;  %v1382_v5 = vld [vmem:[%s1909_s1] ss:$0 sm:$0xff]  ;;  %vm396_vm2 = vcmask 130048   ;;  %v1180_v10 = vmov 0.0   ;;  %v380_v54 = vld [vmem:[%s1912_s4 + $0x8] sm:$0xff] }
  0x35   : > { %v379_v47 = vld [vmem:[%s1912_s4] sm:$0xff]  ;;  %v384_v56 = vld [vmem:[%s1912_s4 + $0x28] sm:$0xff] }
  0x36   : > { %428 = vmatpush.bf16.msra.mxu0 %v395_v3  ;;  %1106 = vmatpush.bf16.msra.mxu1 %v395_v3  ;;  %v305_v6 = vshrl.u32 %v304_v4, 7  ;;  %v383_v48 = vld [vmem:[%s1912_s4 + $0x20] sm:$0xff]  ;;  %v381_v4 = vld [vmem:[%s1912_s4 + $0x10] sm:$0xff] }
  0x37   : > { %1107 = vmatpush.bf16.msra.mxu2 %v395_v3  ;;  %1108 = vmatpush.bf16.msra.mxu3 %v395_v3  ;;  %v387_v53 = vld [vmem:[%s1912_s4 + $0x40] sm:$0xff]  ;;  %v388_v3 = vld [vmem:[%s1912_s4 + $0x48] sm:$0xff] }
  0x38   : > { %v306_v7 = vadd.s32 8, %v305_v6  ;;  %vm323_vm3 = vcmp.eq.s32.totalorder %v305_v6, %v1382_v5  ;;  %v309_v8 = vadd.s32 32, %v305_v6  ;;  %v310_v9 = vadd.s32 40, %v305_v6  ;;  %v391_v55 = vld [vmem:[%s1912_s4 + $0x60] sm:$0xff] }
  0x39   : > { %v1050_v11 = vsel %vm323_vm3, 1.0, %v1180_v10  ;;  %v313_v12 = vadd.s32 64, %v305_v6  ;;  %v314_v13 = vadd.s32 72, %v305_v6  ;;  %v317_v14 = vadd.s32 96, %v305_v6 }
  0x3a   : > { %vm324_vm4 = vcmp.eq.s32.totalorder %v306_v7, %v1382_v5  ;;  %vm327_vm5 = vcmp.eq.s32.totalorder %v309_v8, %v1382_v5  ;;  %vm328_vm6 = vcmp.eq.s32.totalorder %v310_v9, %v1382_v5  ;;  %v318_v15 = vadd.s32 104, %v305_v6 }
  0x3b   : > { %v1051_v16 = vsel %vm324_vm4, 1.0, %v1180_v10  ;;  %v1054_v17 = vsel %vm327_vm5, 1.0, %v1180_v10  ;;  %v1055_v18 = vsel %vm328_vm6, 1.0, %v1180_v10  ;;  %vm331_vm7 = vcmp.eq.s32.totalorder %v313_v12, %v1382_v5 }
  0x3c   : > { %v371_v19 = vpack.c.bf16 %v1051_v16, %v1050_v11  ;;  %v373_v20 = vpack.c.bf16 %v1055_v18, %v1054_v17  ;;  %vm332_vm8 = vcmp.eq.s32.totalorder %v314_v13, %v1382_v5  ;;  %v1058_v21 = vsel %vm331_vm7, 1.0, %v1180_v10  ;;  %v382_v16 = vld [vmem:[%s1912_s4 + $0x18] sm:$0xff]  ;;  %v393_v17 = vld [vmem:[%s1912_s4 + $0x70] sm:$0xff] }
  0x3d   : > { %v1059_v22 = vsel %vm332_vm8, 1.0, %v1180_v10  ;;  %vm335_vm9 = vcmp.eq.s32.totalorder %v317_v14, %v1382_v5  ;;  %vm336_vm10 = vcmp.eq.s32.totalorder %v318_v15, %v1382_v5  ;;  %v307_v27 = vadd.s32 16, %v305_v6  ;;  %v389_v15 = vld [vmem:[%s1912_s4 + $0x50] sm:$0xff]  ;;  %v386_v18 = vld [vmem:[%s1912_s4 + $0x38] sm:$0xff] }
  0x3e   : > { %1066 = vmatmul.msk.bf16.vlgmr.msra.gmra.mxu0 %vm396_vm2, %v371_v19  ;;  %1068 = vmatmul.msk.bf16.vlgmr.msra.gmra.mxu1 %vm396_vm2, %v373_v20  ;;  %v375_v23 = vpack.c.bf16 %v1059_v22, %v1058_v21  ;;  %v1062_v24 = vsel %vm335_vm9, 1.0, %v1180_v10  ;;  %v1063_v25 = vsel %vm336_vm10, 1.0, %v1180_v10  ;;  %v308_v28 = vadd.s32 24, %v305_v6 }
  0x3f   : > { %v377_v26 = vpack.c.bf16 %v1063_v25, %v1062_v24  ;;  %v311_v29 = vadd.s32 48, %v305_v6  ;;  %v312_v30 = vadd.s32 56, %v305_v6  ;;  %v315_v31 = vadd.s32 80, %v305_v6 }
  0x40   : > { %1070 = vmatmul.msk.bf16.vlgmr.msra.gmra.mxu2 %vm396_vm2, %v375_v23  ;;  %v316_v32 = vadd.s32 88, %v305_v6  ;;  %vm325_vm11 = vcmp.eq.s32.totalorder %v307_v27, %v1382_v5  ;;  %vm326_vm12 = vcmp.eq.s32.totalorder %v308_v28, %v1382_v5  ;;  %v319_v33 = vadd.s32 112, %v305_v6  ;;  %v390_v27 = vld [vmem:[%s1912_s4 + $0x58] sm:$0xff] }
  0x41   : > { %1072 = vmatmul.msk.bf16.vlgmr.msra.gmra.mxu3 %vm396_vm2, %v377_v26  ;;  %v320_v34 = vadd.s32 120, %v305_v6  ;;  %vm329_vm13 = vcmp.eq.s32.totalorder %v311_v29, %v1382_v5  ;;  %vm330_vm14 = vcmp.eq.s32.totalorder %v312_v30, %v1382_v5  ;;  %v1052_v35 = vsel %vm325_vm11, 1.0, %v1180_v10  ;;  %v385_v6 = vld [vmem:[%s1912_s4 + $0x30] sm:$0xff]  ;;  %v394_v28 = vld [vmem:[%s1912_s4 + $0x78] sm:$0xff] }
  0x42   : > { %v1053_v36 = vsel %vm326_vm12, 1.0, %v1180_v10  ;;  %vm333_vm15 = vcmp.eq.s32.totalorder %v315_v31, %v1382_v5  ;;  %vm334_vm0 = vcmp.eq.s32.totalorder %v316_v32, %v1382_v5  ;;  %v1056_v37 = vsel %vm329_vm13, 1.0, %v1180_v10 }
  0x43   : > { %v1057_v38 = vsel %vm330_vm14, 1.0, %v1180_v10  ;;  %vm337_vm1 = vcmp.eq.s32.totalorder %v319_v33, %v1382_v5  ;;  %vm338_vm3 = vcmp.eq.s32.totalorder %v320_v34, %v1382_v5  ;;  %v1060_v39 = vsel %vm333_vm15, 1.0, %v1180_v10  ;;  %v392_v5 = vld [vmem:[%s1912_s4 + $0x68] sm:$0xff] }
  0x44   : > { %v1061_v40 = vsel %vm334_vm0, 1.0, %v1180_v10  ;;  %v372_v41 = vpack.c.bf16 %v1053_v36, %v1052_v35  ;;  %v374_v42 = vpack.c.bf16 %v1057_v38, %v1056_v37  ;;  %v1064_v43 = vsel %vm337_vm1, 1.0, %v1180_v10 }
  0x45   : > { %v1065_v44 = vsel %vm338_vm3, 1.0, %v1180_v10  ;;  %v376_v45 = vpack.c.bf16 %v1061_v40, %v1060_v39  ;;  %vm486_vm4 = vcmask 261120  }
  0x46   : > { %v378_v46 = vpack.c.bf16 %v1065_v44, %v1064_v43 }
  0x4e   : > { %1067 = vmatmul.msk.bf16.gmra.mxu0 %vm396_vm2, %v372_v41  ;;  %1069 = vmatmul.msk.bf16.gmra.mxu1 %vm396_vm2, %v374_v42 }
  0x50   : > { %1071 = vmatmul.msk.bf16.gmra.mxu2 %vm396_vm2, %v376_v45 }
  0x51   : > { %1073 = vmatmul.msk.bf16.gmra.mxu3 %vm396_vm2, %v378_v46 }
  0xbb   : > { %v430_v49 = vpop.f32.mrf.mxu0  ;;  %v440_v50 = vpop.f32.mrf.mxu1 }
  0xbc   : > { %v470_v51 = vadd.f32 %v430_v49, %v379_v47  ;;  %v474_v52 = vadd.f32 %v440_v50, %v383_v48 }
  0xbe   : > { %487 = vst.msk [vmem:[%s1912_s4] sm:$0xff] %vm486_vm4, %v470_v51 }
  0xbf   : > { %491 = vst.msk [vmem:[%s1912_s4 + $0x20] sm:$0xff] %vm486_vm4, %v474_v52 }
  0xc3   : > { %v450_v57 = vpop.f32.mrf.mxu2  ;;  %v432_v58 = vpop.f32.mrf.mxu0 }
  0xc4   : > { %v478_v59 = vadd.f32 %v450_v57, %v387_v53  ;;  %v460_v60 = vpop.f32.mrf.mxu3  ;;  %v471_v61 = vadd.f32 %v432_v58, %v380_v54  ;;  %v442_v62 = vpop.f32.mrf.mxu1 }
  0xc5   : > { %v482_v63 = vadd.f32 %v460_v60, %v391_v55  ;;  %v475_v2 = vadd.f32 %v442_v62, %v384_v56 }
  0xc6   : > { %495 = vst.msk [vmem:[%s1912_s4 + $0x40] sm:$0xff] %vm486_vm4, %v478_v59 }
  0xc7   : > { %499 = vst.msk [vmem:[%s1912_s4 + $0x60] sm:$0xff] %vm486_vm4, %v482_v63 }
  0xc8   : > { %488 = vst.msk [vmem:[%s1912_s4 + $0x8] sm:$0xff] %vm486_vm4, %v471_v61 }
  0xc9   : > { %492 = vst.msk [vmem:[%s1912_s4 + $0x28] sm:$0xff] %vm486_vm4, %v475_v2 }
  0xcb   : > { %v452_v7 = vpop.f32.mrf.mxu2  ;;  %v435_v8 = vpop.f32.mrf.mxu0 }
  0xcc   : > { %v479_v9 = vadd.f32 %v452_v7, %v388_v3  ;;  %v462_v10 = vpop.f32.mrf.mxu3  ;;  %v472_v11 = vadd.f32 %v435_v8, %v381_v4  ;;  %v445_v12 = vpop.f32.mrf.mxu1 }
  0xcd   : > { %v483_v13 = vadd.f32 %v462_v10, %v392_v5  ;;  %v476_v14 = vadd.f32 %v445_v12, %v385_v6 }
  0xce   : > { %496 = vst.msk [vmem:[%s1912_s4 + $0x48] sm:$0xff] %vm486_vm4, %v479_v9 }
  0xcf   : > { %500 = vst.msk [vmem:[%s1912_s4 + $0x68] sm:$0xff] %vm486_vm4, %v483_v13 }
  0xd0   : > { %489 = vst.msk [vmem:[%s1912_s4 + $0x10] sm:$0xff] %vm486_vm4, %v472_v11 }
  0xd1   : > { %493 = vst.msk [vmem:[%s1912_s4 + $0x30] sm:$0xff] %vm486_vm4, %v476_v14 }
  0xd3   : > { %v455_v19 = vpop.f32.mrf.mxu2  ;;  %v437_v20 = vpop.f32.mrf.mxu0 }
  0xd4   : > { %v480_v21 = vadd.f32 %v455_v19, %v389_v15  ;;  %v465_v22 = vpop.f32.mrf.mxu3  ;;  %v473_v23 = vadd.f32 %v437_v20, %v382_v16  ;;  %v447_v24 = vpop.f32.mrf.mxu1 }
  0xd5   : > { %v484_v25 = vadd.f32 %v465_v22, %v393_v17  ;;  %v477_v26 = vadd.f32 %v447_v24, %v386_v18 }
  0xd6   : > { %497 = vst.msk [vmem:[%s1912_s4 + $0x50] sm:$0xff] %vm486_vm4, %v480_v21 }
  0xd7   : > { %501 = vst.msk [vmem:[%s1912_s4 + $0x70] sm:$0xff] %vm486_vm4, %v484_v25 }
  0xd8   : > { %490 = vst.msk [vmem:[%s1912_s4 + $0x18] sm:$0xff] %vm486_vm4, %v473_v23 }
  0xd9   : > { %494 = vst.msk [vmem:[%s1912_s4 + $0x38] sm:$0xff] %vm486_vm4, %v477_v26 }
  0xdb   : > { %v457_v29 = vpop.f32.mrf.mxu2 }
  0xdc   : > { %v481_v30 = vadd.f32 %v457_v29, %v390_v27  ;;  %v467_v31 = vpop.f32.mrf.mxu3 }
  0xdd   : > { %v485_v32 = vadd.f32 %v467_v31, %v394_v28 }
  0xde   : > { %498 = vst.msk [vmem:[%s1912_s4 + $0x58] sm:$0xff] %vm486_vm4, %v481_v30 }
  0xdf   : > { %502 = vst.msk [vmem:[%s1912_s4 + $0x78] sm:$0xff] %vm486_vm4, %v485_v32 }
  0xe0 PF: > { %504 = sbr.rel (!%p261_p4) target bundleno = 385 (0x181), region = 48  ;;  %v525_v33 = vld [vmem:[%s1911_s3 + $0x20] sm:$0xff] (%p261_p4)  ;;  %v523_v34 = vld [vmem:[%s1911_s3 + $0x10] sm:$0xff] (%p261_p4)  ;;  %v1181_v36 = vmov (%p261_p4), 0   ;;  %v526_v37 = vld [vmem:[%s1911_s3 + $0x28] sm:$0xff] (%p261_p4)  ;;  %vm633_vm2 = vcmask (%p261_p4), 261120  }
  0xe1   : > { %v521_v35 = vld [vmem:[%s1911_s3] sm:$0xff] (%p261_p4)  ;;  %1144 = vset.pattern.permute.xlu2 (%p261_p4), %v1181_v36  ;;  %1143 = vset.pattern.permute.xlu1 (%p261_p4), %v1181_v36  ;;  %v524_v38 = vld [vmem:[%s1911_s3 + $0x18] sm:$0xff] (%p261_p4)  ;;  %v522_v39 = vld [vmem:[%s1911_s3 + $0x8] sm:$0xff] (%p261_p4) }
  0xe2   : > { %1142 = vset.pattern.permute.xlu0 (%p261_p4), %v1181_v36  ;;  %559 = vperm.xlu2 (%p261_p4), %1144, %v525_v33   ;;  %v529_v40 = vld [vmem:[%s1911_s3 + $0x40] sm:$0xff] (%p261_p4)  ;;  %v528_v41 = vld [vmem:[%s1911_s3 + $0x38] sm:$0xff] (%p261_p4)  ;;  %v527_v42 = vld [vmem:[%s1911_s3 + $0x30] sm:$0xff] (%p261_p4) }
  0xe3   : > { %549 = vperm.xlu1 (%p261_p4), %1143, %v523_v34   ;;  %539 = vperm.xlu0 (%p261_p4), %1142, %v521_v35   ;;  %v532_v43 = vld [vmem:[%s1911_s3 + $0x58] sm:$0xff] (%p261_p4)  ;;  %v531_v44 = vld [vmem:[%s1911_s3 + $0x50] sm:$0xff] (%p261_p4)  ;;  %v530_v45 = vld [vmem:[%s1911_s3 + $0x48] sm:$0xff] (%p261_p4) }
  0xe4   : > { %v535_v46 = vld [vmem:[%s1911_s3 + $0x70] sm:$0xff] (%p261_p4)  ;;  %v534_v47 = vld [vmem:[%s1911_s3 + $0x68] sm:$0xff] (%p261_p4)  ;;  %v533_v48 = vld [vmem:[%s1911_s3 + $0x60] sm:$0xff] (%p261_p4) }
  0xe5   : > { %v536_v49 = vld [vmem:[%s1911_s3 + $0x78] sm:$0xff]  ;;  %v509_v50 = vld [vmem:[%s1912_s4 + $0x20] sm:$0xff]  ;;  %v510_v53 = vld [vmem:[%s1912_s4 + $0x28] sm:$0xff] }
  0xe6   : > { %v513_v56 = vld [vmem:[%s1912_s4 + $0x40] sm:$0xff]  ;;  %v516_v59 = vld [vmem:[%s1912_s4 + $0x58] sm:$0xff]  ;;  %v507_v60 = vld [vmem:[%s1912_s4 + $0x10] sm:$0xff] }
  0xe7   : > { %v505_v61 = vld [vmem:[%s1912_s4] sm:$0xff]  ;;  %v519_v6 = vld [vmem:[%s1912_s4 + $0x70] sm:$0xff]  ;;  %v508_v7 = vld [vmem:[%s1912_s4 + $0x18] sm:$0xff] }
  0xe8   : > { %v506_v8 = vld [vmem:[%s1912_s4 + $0x8] sm:$0xff]  ;;  %v512_v15 = vld [vmem:[%s1912_s4 + $0x38] sm:$0xff]  ;;  %v511_v16 = vld [vmem:[%s1912_s4 + $0x30] sm:$0xff] }
  0xe9   : > { %v515_v21 = vld [vmem:[%s1912_s4 + $0x50] sm:$0xff]  ;;  %v514_v22 = vld [vmem:[%s1912_s4 + $0x48] sm:$0xff]  ;;  %v517_v28 = vld [vmem:[%s1912_s4 + $0x60] sm:$0xff] }
  0xea   : > { %564 = vperm.xlu2 %1144, %v526_v37   ;;  %v518_v27 = vld [vmem:[%s1912_s4 + $0x68] sm:$0xff]  ;;  %v520_v33 = vld [vmem:[%s1912_s4 + $0x78] sm:$0xff] }
  0xeb   : > { %554 = vperm.xlu1 %1143, %v524_v38   ;;  %544 = vperm.xlu0 %1142, %v522_v39  }
  0xf2   : > { %579 = vperm.xlu2 %1144, %v529_v40  }
  0xf3   : > { %574 = vperm.xlu1 %1143, %v528_v41   ;;  %569 = vperm.xlu0 %1142, %v527_v42  }
  0xfa   : > { %594 = vperm.xlu2 %1144, %v532_v43  }
  0xfb   : > { %589 = vperm.xlu1 %1143, %v531_v44   ;;  %584 = vperm.xlu0 %1142, %v530_v45  }
 0x102   : > { %609 = vperm.xlu2 %1144, %v535_v46  }
 0x103   : > { %604 = vperm.xlu1 %1143, %v534_v47   ;;  %599 = vperm.xlu0 %1142, %v533_v48  }
 0x10b   : > { %614 = vperm.xlu0 %1142, %v536_v49  }
 0x13c   : > { %v560_v51 = vpop.permute.xlu2 %559 }
 0x13d   : > { %v621_v52 = vmul.f32 %v560_v51, %v509_v50 }
 0x13f   : > { %638 = vst.msk [vmem:[%s1912_s4 + $0x20] sm:$0xff] %vm633_vm2, %v621_v52 }
 0x144   : > { %v565_v54 = vpop.permute.xlu2 %564 }
 0x145   : > { %v622_v55 = vmul.f32 %v565_v54, %v510_v53 }
 0x147   : > { %639 = vst.msk [vmem:[%s1912_s4 + $0x28] sm:$0xff] %vm633_vm2, %v622_v55 }
 0x14c   : > { %v580_v57 = vpop.permute.xlu2 %579 }
 0x14d   : > { %v625_v58 = vmul.f32 %v580_v57, %v513_v56 }
 0x14f   : > { %642 = vst.msk [vmem:[%s1912_s4 + $0x40] sm:$0xff] %vm633_vm2, %v625_v58 }
 0x154   : > { %v595_v62 = vpop.permute.xlu2 %594 }
 0x155   : > { %v628_v63 = vmul.f32 %v595_v62, %v516_v59  ;;  %v550_v2 = vpop.permute.xlu1 %549  ;;  %v540_v3 = vpop.permute.xlu0 %539 }
 0x156   : > { %v619_v4 = vmul.f32 %v550_v2, %v507_v60  ;;  %v617_v5 = vmul.f32 %v540_v3, %v505_v61 }
 0x157   : > { %645 = vst.msk [vmem:[%s1912_s4 + $0x58] sm:$0xff] %vm633_vm2, %v628_v63 }
 0x158   : > { %636 = vst.msk [vmem:[%s1912_s4 + $0x10] sm:$0xff] %vm633_vm2, %v619_v4 }
 0x159   : > { %634 = vst.msk [vmem:[%s1912_s4] sm:$0xff] %vm633_vm2, %v617_v5 }
 0x15c   : > { %v610_v9 = vpop.permute.xlu2 %609 }
 0x15d   : > { %v631_v10 = vmul.f32 %v610_v9, %v519_v6  ;;  %v555_v11 = vpop.permute.xlu1 %554  ;;  %v545_v12 = vpop.permute.xlu0 %544 }
 0x15e   : > { %v620_v13 = vmul.f32 %v555_v11, %v508_v7  ;;  %v618_v14 = vmul.f32 %v545_v12, %v506_v8 }
 0x15f   : > { %648 = vst.msk [vmem:[%s1912_s4 + $0x70] sm:$0xff] %vm633_vm2, %v631_v10 }
 0x160   : > { %637 = vst.msk [vmem:[%s1912_s4 + $0x18] sm:$0xff] %vm633_vm2, %v620_v13 }
 0x161   : > { %635 = vst.msk [vmem:[%s1912_s4 + $0x8] sm:$0xff] %vm633_vm2, %v618_v14 }
 0x165   : > { %v575_v17 = vpop.permute.xlu1 %574  ;;  %v570_v18 = vpop.permute.xlu0 %569 }
 0x166   : > { %v624_v19 = vmul.f32 %v575_v17, %v512_v15  ;;  %v623_v20 = vmul.f32 %v570_v18, %v511_v16 }
 0x168   : > { %641 = vst.msk [vmem:[%s1912_s4 + $0x38] sm:$0xff] %vm633_vm2, %v624_v19 }
 0x169   : > { %640 = vst.msk [vmem:[%s1912_s4 + $0x30] sm:$0xff] %vm633_vm2, %v623_v20 }
 0x16d   : > { %v590_v23 = vpop.permute.xlu1 %589  ;;  %v585_v24 = vpop.permute.xlu0 %584 }
 0x16e   : > { %v627_v25 = vmul.f32 %v590_v23, %v515_v21  ;;  %v626_v26 = vmul.f32 %v585_v24, %v514_v22 }
 0x170   : > { %644 = vst.msk [vmem:[%s1912_s4 + $0x50] sm:$0xff] %vm633_vm2, %v627_v25 }
 0x171   : > { %643 = vst.msk [vmem:[%s1912_s4 + $0x48] sm:$0xff] %vm633_vm2, %v626_v26 }
 0x175   : > { %v605_v29 = vpop.permute.xlu1 %604  ;;  %v600_v30 = vpop.permute.xlu0 %599 }
 0x176   : > { %v630_v31 = vmul.f32 %v605_v29, %v518_v27  ;;  %v629_v32 = vmul.f32 %v600_v30, %v517_v28 }
 0x178   : > { %647 = vst.msk [vmem:[%s1912_s4 + $0x68] sm:$0xff] %vm633_vm2, %v630_v31 }
 0x179   : > { %646 = vst.msk [vmem:[%s1912_s4 + $0x60] sm:$0xff] %vm633_vm2, %v629_v32 }
 0x17d   : > { %v615_v34 = vpop.permute.xlu0 %614 }
 0x17e   : > { %v632_v35 = vmul.f32 %v615_v34, %v520_v33 }
 0x180   : > { %649 = vst.msk [vmem:[%s1912_s4 + $0x78] sm:$0xff] %vm633_vm2, %v632_v35 }
 0x181 PF: > { %p1074_p6 = scmp.ne.s32.totalorder %s1169_s18, 1 }
 0x183   : > { %653 = sbr.rel (%p1074_p6) target bundleno = 998 (0x3e6), region = 52 }
 0x188   : > { %v656_v36 = vld [vmem:[%s1908_s0] sm:$0xff]  ;;  %v685_v37 = vld [vmem:[%s1912_s4 + $0x70] sm:$0xff]  ;;  %v1182_v38 = vmov 0   ;;  %v686_v39 = vld [vmem:[%s1912_s4 + $0x78] sm:$0xff]  ;;  %v654_v2 = vlaneseq  ;;  %v1183_v5 = vmov 1.0|1.0  }
 0x189   : > { %1145 = vset.pattern.permute.xlu0 %v1182_v38  ;;  %v683_v40 = vld [vmem:[%s1912_s4 + $0x60] sm:$0xff]  ;;  %v684_v41 = vld [vmem:[%s1912_s4 + $0x68] sm:$0xff]  ;;  %v694_v42 = vpack.c.bf16 %v686_v39, %v685_v37  ;;  %v681_v44 = vld [vmem:[%s1912_s4 + $0x50] sm:$0xff]  ;;  %vm713_vm8 = vcmask 261120  }
 0x18a   : > { %659 = vperm.xlu0 %1145, %v656_v36   ;;  %v693_v43 = vpack.c.bf16 %v684_v41, %v683_v40  ;;  %v682_v45 = vld [vmem:[%s1912_s4 + $0x58] sm:$0xff]  ;;  %v657_v46 = vld [vmem:[%s1908_s0 + $0x8] sm:$0xff]  ;;  %v679_v48 = vld [vmem:[%s1912_s4 + $0x40] sm:$0xff]  ;;  %v655_v3 = vand.u32 127, %v654_v2 }
 0x18b   : > { %695 = vmatpush.bf16.msra.mxu0 %v694_v42  ;;  %v692_v47 = vpack.c.bf16 %v682_v45, %v681_v44  ;;  %v680_v49 = vld [vmem:[%s1912_s4 + $0x48] sm:$0xff]  ;;  %v677_v51 = vld [vmem:[%s1912_s4 + $0x30] sm:$0xff]  ;;  %v678_v52 = vld [vmem:[%s1912_s4 + $0x38] sm:$0xff]  ;;  %v1739_v42 = vshrl.u32 %v654_v2, 7 }
 0x18c   : > { %v691_v50 = vpack.c.bf16 %v680_v49, %v679_v48  ;;  %v690_v53 = vpack.c.bf16 %v678_v52, %v677_v51  ;;  %v675_v54 = vld [vmem:[%s1912_s4 + $0x20] sm:$0xff]  ;;  %v676_v55 = vld [vmem:[%s1912_s4 + $0x28] sm:$0xff]  ;;  %v673_v57 = vld [vmem:[%s1912_s4 + $0x10] sm:$0xff] }
 0x18d   : > { %v689_v56 = vpack.c.bf16 %v676_v55, %v675_v54  ;;  %v674_v58 = vld [vmem:[%s1912_s4 + $0x18] sm:$0xff]  ;;  %v671_v59 = vld [vmem:[%s1912_s4] sm:$0xff]  ;;  %v672_v61 = vld [vmem:[%s1912_s4 + $0x8] sm:$0xff]  ;;  %v772_v48 = vadd.s32 8, %v1739_v42  ;;  %v777_v49 = vadd.s32 48, %v1739_v42  ;;  %v784_v54 = vadd.s32 104, %v1739_v42 }
 0x18e   : > { %v688_v60 = vpack.c.bf16 %v674_v58, %v673_v57  ;;  %v687_v62 = vpack.c.bf16 %v672_v61, %v671_v59 }
 0x18f   : > { %696 = vmatpush.bf16.msra.mxu0 %v693_v43 }
 0x192   : > { %662 = vperm.xlu0 %1145, %v657_v46   ;;  %v1744_v46 = vld [vmem:[%s1909_s1] ss:$0 sm:$0xff] }
 0x193   : > { %697 = vmatpush.bf16.msra.mxu0 %v692_v47  ;;  %vm789_vm13 = vcmp.eq.s32.totalorder %v1739_v42, %v1744_v46  ;;  %vm790_vm15 = vcmp.eq.s32.totalorder %v772_v48, %v1744_v46  ;;  %vm795_vm1 = vcmp.eq.s32.totalorder %v777_v49, %v1744_v46  ;;  %vm802_vm2 = vcmp.eq.s32.totalorder %v784_v54, %v1744_v46  ;;  %v858_v48 = vld [vmem:[%s1913_s5 + $0x68] sm:$0xff] }
 0x197   : > { %698 = vmatpush.bf16.msra.mxu0 %v691_v50  ;;  %v778_v50 = vadd.s32 56, %v1739_v42 }
 0x199   : > { %vm796_vm3 = vcmp.eq.s32.totalorder %v778_v50, %v1744_v46  ;;  %v847_v50 = vld [vmem:[%s1913_s5 + $0x10] sm:$0xff] }
 0x19b   : > { %699 = vmatpush.bf16.msra.mxu0 %v690_v53  ;;  %v783_v53 = vadd.s32 96, %v1739_v42 }
 0x19d   : > { %vm801_vm4 = vcmp.eq.s32.totalorder %v783_v53, %v1744_v46 }
 0x19f   : > { %700 = vmatpush.bf16.msra.mxu0 %v689_v56 }
 0x1a3   : > { %701 = vmatpush.bf16.msra.mxu0 %v688_v60  ;;  %v1184_v60 = vmov 0.0  }
 0x1a4   : > { %v1079_v61 = vsel %vm789_vm13, 1.0, %v1184_v60  ;;  %v1085_v2 = vsel %vm795_vm1, 1.0, %v1184_v60 }
 0x1a7   : > { %702 = vmatpush.bf16.msra.mxu0 %v687_v62  ;;  %v1080_v62 = vsel %vm790_vm15, 1.0, %v1184_v60 }
 0x1fc   : > { %v660_v63 = vpop.permute.xlu0 %659 }
 0x1fd   : > { %vm664_vm5 = vcmp.eq.s32.totalorder %v655_v3, %v660_v63 }
 0x204   : > { %v663_v4 = vpop.permute.xlu0 %662 }
 0x205   : > { %vm665_vm6 = vcmp.eq.s32.totalorder %v655_v3, %v663_v4  ;;  %v1086_v3 = vsel %vm796_vm3, 1.0, %v1184_v60  ;;  %vm952_vm3 = vcmask 7168  }
 0x206   : > { %vm1077_vm7 = vmpackc.low %vm665_vm6, %vm664_vm5 }
 0x207   : > { %1078 = vmatmul.msk.bf16.vlgmr.msra.gmra.mxu0 %vm1077_vm7, %v1183_v5  ;;  %vm862_vm7 = vcmask 130048  }
 0x284   : > { %v704_v6 = vpop.f32.mrf.mxu0 }
 0x285   : > { %v709_v7 = vsub.f32 %v1238_v0, %v704_v6  ;;  %v1091_v6 = vsel %vm801_vm4, 1.0, %v1184_v60 }
 0x287   : > { %v711_v8 = vmul.f32 %v709_v7, %v709_v7  ;;  %v1092_v7 = vsel %vm802_vm2, 1.0, %v1184_v60 }
 0x289   : > { %v714_v9 = vsel %vm713_vm8, %v711_v8, 0.0 }
 0x28a   : > { %715 = vadd.xlane.f32.xlu1 %v714_v9  ;;  %v837_v9 = vpack.c.bf16 %v1080_v62, %v1079_v61 }
 0x28c   : > { %v706_v10 = vpop.f32.mrf.mxu0 }
 0x28d   : > { %v710_v11 = vsub.f32 %v1243_v1, %v706_v10  ;;  %v840_v10 = vpack.c.bf16 %v1086_v3, %v1085_v2  ;;  %v854_v3 = vld [vmem:[%s1913_s5 + $0x48] sm:$0xff] }
 0x28f   : > { %v712_v12 = vmul.f32 %v710_v11, %v710_v11  ;;  %v843_v11 = vpack.c.bf16 %v1092_v7, %v1091_v6  ;;  %v849_v6 = vld [vmem:[%s1913_s5 + $0x20] sm:$0xff] }
 0x291   : > { %v717_v13 = vsel %vm713_vm8, %v712_v12, 0.0  ;;  %v773_v12 = vadd.s32 16, %v1739_v42 }
 0x292   : > { %718 = vadd.xlane.f32.xlu1 %v717_v13  ;;  %v774_v13 = vadd.s32 24, %v1739_v42 }
 0x293   : > { %vm791_vm8 = vcmp.eq.s32.totalorder %v773_v12, %v1744_v46  ;;  %v855_v12 = vld [vmem:[%s1913_s5 + $0x50] sm:$0xff] }
 0x2fd   : > { %v716_v14 = vpop.xlane.xlu1 %715 }
 0x2fe   : > { %v720_v15 = vmax.f32 %v716_v14, 0.0  ;;  %v779_v14 = vadd.s32 64, %v1739_v42 }
 0x300   : > { %1147 = vrsqrt.f32 %v720_v15  ;;  %vm729_vm9 = vcmp.eq.f32.partialorder %v720_v15, inf  ;;  %v732_v1 = vand.u32 2147483648, %v720_v15  ;;  %vm731_vm10 = vcmp.eq.f32.partialorder %v720_v15, 0.0 }
 0x305   : > { %v719_v16 = vpop.xlane.xlu1 %718 }
 0x306   : > { %v1148_v17 = vpop.eup %1147  ;;  %v721_v18 = vmax.f32 %v719_v16, 0.0  ;;  %v785_v16 = vadd.s32 112, %v1739_v42 }
 0x307   : > { %v723_v19 = vmul.f32 %v1148_v17, %v720_v15 }
 0x308   : > { %1149 = vrsqrt.f32 %v721_v18  ;;  %vm741_vm11 = vcmp.eq.f32.partialorder %v721_v18, inf  ;;  %v744_v33 = vand.u32 2147483648, %v721_v18  ;;  %vm743_vm12 = vcmp.eq.f32.partialorder %v721_v18, 0.0 }
 0x309   : > { %v724_v20 = vmul.f32 %v1148_v17, %v723_v19 }
 0x30b   : > { %v725_v0 = vmul.f32 0.5, %v724_v20 }
 0x30d   : > { %v726_v21 = vsub.f32 1.5, %v725_v0 }
 0x30e   : > { %v1150_v22 = vpop.eup %1149 }
 0x30f   : > { %v727_v23 = vmul.f32 %v1148_v17, %v726_v21  ;;  %v735_v24 = vmul.f32 %v1150_v22, %v721_v18  ;;  %v786_v17 = vadd.s32 120, %v1739_v42 }
 0x311   : > { %v728_v25 = vmul.f32 %v727_v23, %v720_v15  ;;  %v736_v26 = vmul.f32 %v1150_v22, %v735_v24  ;;  %vm804_vm13 = vcmp.eq.s32.totalorder %v786_v17, %v1744_v46 }
 0x313   : > { %v737_v27 = vmul.f32 0.5, %v736_v26  ;;  %v730_v28 = vsel %vm729_vm9, %v720_v15, %v728_v25  ;;  %v780_v15 = vadd.s32 72, %v1739_v42  ;;  %vm792_vm9 = vcmp.eq.s32.totalorder %v774_v13, %v1744_v46 }
 0x314   : > { %v733_v29 = vsel %vm731_vm10, %v732_v1, %v730_v28  ;;  %vm797_vm10 = vcmp.eq.s32.totalorder %v779_v14, %v1744_v46  ;;  %v1082_v19 = vsel %vm792_vm9, 1.0, %v1184_v60  ;;  %v775_v26 = vadd.s32 32, %v1739_v42  ;;  %v850_v14 = vld [vmem:[%s1913_s5 + $0x28] sm:$0xff] }
 0x315   : > { %v738_v30 = vsub.f32 1.5, %v737_v27  ;;  %1151 = vrsqrt.f32 %v733_v29  ;;  %vm753_vm14 = vcmp.eq.f32.partialorder %v733_v29, inf  ;;  %vm755_vm0 = vcmp.eq.f32.partialorder %v733_v29, 0.0 }
 0x316   : > { %v756_v56 = vand.u32 2147483648, %v733_v29  ;;  %v1087_v20 = vsel %vm797_vm10, 1.0, %v1184_v60  ;;  %v776_v1 = vadd.s32 40, %v1739_v42  ;;  %v781_v27 = vadd.s32 80, %v1739_v42 }
 0x317   : > { %v739_v31 = vmul.f32 %v1150_v22, %v738_v30  ;;  %v1094_v22 = vsel %vm804_vm13, 1.0, %v1184_v60  ;;  %v782_v28 = vadd.s32 88, %v1739_v42 }
 0x318   : > { %vm794_vm15 = vcmp.eq.s32.totalorder %v776_v1, %v1744_v46 }
 0x319   : > { %v740_v32 = vmul.f32 %v739_v31, %v721_v18  ;;  %vm800_vm1 = vcmp.eq.s32.totalorder %v782_v28, %v1744_v46  ;;  %v1084_v30 = vsel %vm794_vm15, 1.0, %v1184_v60 }
 0x31b   : > { %v1152_v34 = vpop.eup %1151  ;;  %v742_v35 = vsel %vm741_vm11, %v721_v18, %v740_v32  ;;  %vm798_vm11 = vcmp.eq.s32.totalorder %v780_v15, %v1744_v46  ;;  %v1081_v18 = vsel %vm791_vm8, 1.0, %v1184_v60  ;;  %v1090_v32 = vsel %vm800_vm1, 1.0, %v1184_v60 }
 0x31c   : > { %v745_v36 = vsel %vm743_vm12, %v744_v33, %v742_v35  ;;  %v747_v37 = vmul.f32 %v1152_v34, %v733_v29  ;;  %vm803_vm12 = vcmp.eq.s32.totalorder %v785_v16, %v1744_v46  ;;  %v1088_v0 = vsel %vm798_vm11, 1.0, %v1184_v60  ;;  %v845_v35 = vld [vmem:[%s1913_s5] sm:$0xff] }
 0x31d   : > { %1153 = vrsqrt.f32 %v745_v36  ;;  %vm765_vm5 = vcmp.eq.f32.partialorder %v745_v36, inf  ;;  %v768_v59 = vand.u32 2147483648, %v745_v36  ;;  %vm767_vm6 = vcmp.eq.f32.partialorder %v745_v36, 0.0 }
 0x31e   : > { %v748_v38 = vmul.f32 %v1152_v34, %v747_v37  ;;  %v1093_v21 = vsel %vm803_vm12, 1.0, %v1184_v60  ;;  %v838_v23 = vpack.c.bf16 %v1082_v19, %v1081_v18  ;;  %v841_v24 = vpack.c.bf16 %v1088_v0, %v1087_v20  ;;  %v856_v18 = vld [vmem:[%s1913_s5 + $0x58] sm:$0xff] }
 0x31f   : > { %v844_v25 = vpack.c.bf16 %v1094_v22, %v1093_v21 }
 0x320   : > { %v749_v39 = vmul.f32 0.5, %v748_v38  ;;  %v851_v38 = vld [vmem:[%s1913_s5 + $0x30] sm:$0xff] }
 0x322   : > { %v750_v40 = vsub.f32 1.5, %v749_v39  ;;  %v857_v39 = vld [vmem:[%s1913_s5 + $0x60] sm:$0xff] }
 0x323   : > { %v1154_v41 = vpop.eup %1153 }
 0x324   : > { %v759_v43 = vmul.f32 %v1154_v41, %v745_v36  ;;  %v751_v44 = vmul.f32 %v1152_v34, %v750_v40 }
 0x326   : > { %v760_v45 = vmul.f32 %v1154_v41, %v759_v43  ;;  %v752_v51 = vmul.f32 %v751_v44, %v733_v29 }
 0x328   : > { %v761_v47 = vmul.f32 0.5, %v760_v45  ;;  %v754_v57 = vsel %vm753_vm14, %v733_v29, %v752_v51  ;;  %vm793_vm14 = vcmp.eq.s32.totalorder %v775_v26, %v1744_v46 }
 0x329   : > { %v757_v4 = vsel %vm755_vm0, %v756_v56, %v754_v57  ;;  %vm799_vm0 = vcmp.eq.s32.totalorder %v781_v27, %v1744_v46  ;;  %v1083_v29 = vsel %vm793_vm14, 1.0, %v1184_v60  ;;  %v853_v56 = vld [vmem:[%s1913_s5 + $0x40] sm:$0xff]  ;;  %v859_v57 = vld [vmem:[%s1913_s5 + $0x70] sm:$0xff] }
 0x32a   : > { %v762_v52 = vsub.f32 1.5, %v761_v47  ;;  %v1089_v31 = vsel %vm799_vm0, 1.0, %v1184_v60  ;;  %v839_v33 = vpack.c.bf16 %v1084_v30, %v1083_v29  ;;  %v852_v47 = vld [vmem:[%s1913_s5 + $0x38] sm:$0xff] }
 0x32b   : > { %v842_v34 = vpack.c.bf16 %v1090_v32, %v1089_v31 }
 0x32c   : > { %v763_v55 = vmul.f32 %v1154_v41, %v762_v52  ;;  %v846_v41 = vld [vmem:[%s1913_s5 + $0x8] sm:$0xff] }
 0x32e   : > { %v764_v58 = vmul.f32 %v763_v55, %v745_v36 }
 0x330   : > { %v766_v63 = vsel %vm765_vm5, %v745_v36, %v764_v58 }
 0x331   : > { %v769_v5 = vsel %vm767_vm6, %v768_v59, %v766_v63  ;;  %v848_v59 = vld [vmem:[%s1913_s5 + $0x18] sm:$0xff] }
 0x332   : > { %v861_v8 = vpack.c.bf16 %v769_v5, %v757_v4  ;;  %v860_v4 = vld [vmem:[%s1913_s5 + $0x78] sm:$0xff] }
 0x334   : > { %894 = vmatpush.bf16.msra.mxu1 %v861_v8  ;;  %1109 = vmatpush.bf16.msra.mxu2 %v861_v8 }
 0x335   : > { %1110 = vmatpush.bf16.msra.mxu3 %v861_v8 }
 0x337   : > { %1095 = vmatmul.msk.bf16.vlgmr.msra.gmra.mxu1 %vm862_vm7, %v837_v9  ;;  %1098 = vmatmul.msk.bf16.vlgmr.msra.gmra.mxu2 %vm862_vm7, %v840_v10 }
 0x338   : > { %1101 = vmatmul.msk.bf16.vlgmr.msra.gmra.mxu3 %vm862_vm7, %v843_v11 }
 0x347   : > { %1096 = vmatmul.msk.bf16.gmra.mxu1 %vm862_vm7, %v838_v23  ;;  %1099 = vmatmul.msk.bf16.gmra.mxu2 %vm862_vm7, %v841_v24 }
 0x348   : > { %1102 = vmatmul.msk.bf16.gmra.mxu3 %vm862_vm7, %v844_v25 }
 0x357   : > { %1097 = vmatmul.msk.bf16.gmra.mxu1 %vm862_vm7, %v839_v33  ;;  %1100 = vmatmul.msk.bf16.gmra.mxu2 %vm862_vm7, %v842_v34 }
 0x3b4   : > { %v896_v36 = vpop.f32.mrf.mxu1 }
 0x3b5   : > { %v936_v37 = vadd.f32 %v896_v36, %v845_v35 }
 0x3b7   : > { %953 = vst.msk [vmem:[%s1913_s5] sm:$0xff] %vm952_vm3, %v936_v37 }
 0x3ba   : > { %v911_v40 = vpop.f32.mrf.mxu2 }
 0x3bb   : > { %v942_v42 = vadd.f32 %v911_v40, %v851_v38  ;;  %v926_v43 = vpop.f32.mrf.mxu3 }
 0x3bc   : > { %v898_v44 = vpop.f32.mrf.mxu1  ;;  %v948_v45 = vadd.f32 %v926_v43, %v857_v39 }
 0x3bd   : > { %959 = vst.msk [vmem:[%s1913_s5 + $0x30] sm:$0xff] %vm952_vm3, %v942_v42  ;;  %v937_v46 = vadd.f32 %v898_v44, %v846_v41 }
 0x3be   : > { %965 = vst.msk [vmem:[%s1913_s5 + $0x60] sm:$0xff] %vm952_vm3, %v948_v45 }
 0x3bf   : > { %954 = vst.msk [vmem:[%s1913_s5 + $0x8] sm:$0xff] %vm952_vm3, %v937_v46 }
 0x3c2   : > { %v913_v49 = vpop.f32.mrf.mxu2 }
 0x3c3   : > { %v943_v51 = vadd.f32 %v913_v49, %v852_v47  ;;  %v928_v52 = vpop.f32.mrf.mxu3 }
 0x3c4   : > { %v901_v53 = vpop.f32.mrf.mxu1  ;;  %v949_v54 = vadd.f32 %v928_v52, %v858_v48 }
 0x3c5   : > { %960 = vst.msk [vmem:[%s1913_s5 + $0x38] sm:$0xff] %vm952_vm3, %v943_v51  ;;  %v938_v55 = vadd.f32 %v901_v53, %v847_v50 }
 0x3c6   : > { %966 = vst.msk [vmem:[%s1913_s5 + $0x68] sm:$0xff] %vm952_vm3, %v949_v54 }
 0x3c7   : > { %955 = vst.msk [vmem:[%s1913_s5 + $0x10] sm:$0xff] %vm952_vm3, %v938_v55 }
 0x3ca   : > { %v916_v58 = vpop.f32.mrf.mxu2 }
 0x3cb   : > { %v944_v60 = vadd.f32 %v916_v58, %v853_v56  ;;  %v931_v61 = vpop.f32.mrf.mxu3 }
 0x3cc   : > { %v903_v62 = vpop.f32.mrf.mxu1  ;;  %v950_v63 = vadd.f32 %v931_v61, %v859_v57 }
 0x3cd   : > { %961 = vst.msk [vmem:[%s1913_s5 + $0x40] sm:$0xff] %vm952_vm3, %v944_v60  ;;  %v939_v2 = vadd.f32 %v903_v62, %v848_v59 }
 0x3ce   : > { %967 = vst.msk [vmem:[%s1913_s5 + $0x70] sm:$0xff] %vm952_vm3, %v950_v63 }
 0x3cf   : > { %956 = vst.msk [vmem:[%s1913_s5 + $0x18] sm:$0xff] %vm952_vm3, %v939_v2 }
 0x3d2   : > { %v918_v5 = vpop.f32.mrf.mxu2 }
 0x3d3   : > { %v945_v7 = vadd.f32 %v918_v5, %v854_v3  ;;  %v933_v8 = vpop.f32.mrf.mxu3 }
 0x3d4   : > { %v906_v9 = vpop.f32.mrf.mxu1  ;;  %v951_v10 = vadd.f32 %v933_v8, %v860_v4 }
 0x3d5   : > { %962 = vst.msk [vmem:[%s1913_s5 + $0x48] sm:$0xff] %vm952_vm3, %v945_v7  ;;  %v940_v11 = vadd.f32 %v906_v9, %v849_v6 }
 0x3d6   : > { %968 = vst.msk [vmem:[%s1913_s5 + $0x78] sm:$0xff] %vm952_vm3, %v951_v10 }
 0x3d7   : > { %957 = vst.msk [vmem:[%s1913_s5 + $0x20] sm:$0xff] %vm952_vm3, %v940_v11 }
 0x3da   : > { %v921_v13 = vpop.f32.mrf.mxu2 }
 0x3db   : > { %v946_v15 = vadd.f32 %v921_v13, %v855_v12 }
 0x3dc   : > { %v908_v16 = vpop.f32.mrf.mxu1 }
 0x3dd   : > { %963 = vst.msk [vmem:[%s1913_s5 + $0x50] sm:$0xff] %vm952_vm3, %v946_v15  ;;  %v941_v17 = vadd.f32 %v908_v16, %v850_v14 }
 0x3df   : > { %958 = vst.msk [vmem:[%s1913_s5 + $0x28] sm:$0xff] %vm952_vm3, %v941_v17 }
 0x3e2   : > { %v923_v19 = vpop.f32.mrf.mxu2 }
 0x3e3   : > { %v947_v20 = vadd.f32 %v923_v19, %v856_v18 }
 0x3e5   : > { %964 = vst.msk [vmem:[%s1913_s5 + $0x58] sm:$0xff] %vm952_vm3, %v947_v20 }
 0x3e6 PF: > { %s16_s20 = sadd.s32 1, %s1177_s20   ;;  %s1914_s18 = smov %s1173_s19 }
 0x3e7   : > { %p13_p7 = scmp.ge.s32.totalorder %s16_s20, 4   ;;  %s1915_s19 = smov %s1917_s21 }
 0x3e9   :  { %15 = sbr.rel (!%p13_p7) target bundleno = 2 (0x2), region = 92 }

</bundles_post_ra>
